<compile_context>
chip_gen: v5e
topology: v5e:2x2
jax: 0.10.0
libtpu: 0.0.40
codegen_flags: <defaults>
</compile_context>

<pallas_src>
import functools

import numpy as np

import jax
import jax.numpy as jnp
from jax.experimental import pallas as pl
from jax.experimental.pallas import tpu as pltpu


# ----------------------------------------------------------------------------
# Fused Pallas kernel: whole LeNet-5 forward for Tb images per grid step.
# Activations live in a "band-row" layout: image b occupies rows [b*32, b*32+32)
# (then 16-row bands after pool1, 8-row bands after pool2, 1 row after fc1).
# Only the leading rows of each band are valid; trailing rows are scratch/garbage
# that is provably never read by a valid output row.
# ----------------------------------------------------------------------------
def _lenet5_kernel(tb, x_ref,
                   r1_ref, b1_ref, q1_ref,
                   r2_ref, b2_ref, q2_ref,
                   wf1_ref, bf1_ref, wf2_ref, bf2_ref, wf3_ref, bf3_ref,
                   o_ref, s1_ref, s2_ref, s3_ref):
    f32, bf16 = jnp.float32, jnp.bfloat16
    R1, R2, R3 = tb * 32, tb * 16, tb * 8      # band-rows per stage

    def sigmoid(v):                            # == 1/(1+exp(-v)); tanh uses the EUP slot
        return 0.5 * jnp.tanh(0.5 * v) + 0.5

    def shift_rows(v, k):
        # v[r] <- v[r+k].  Wrapped rows land only in unused trailing band rows.
        if k == 0:
            return v
        return pltpu.roll(v, shift=v.shape[0] - k, axis=0)

    def mxu(a, w_ref):                         # bf16 MXU matmul, f32 accumulation
        return jnp.dot(a.astype(bf16), w_ref[...], preferred_element_type=f32)

    # ---- conv1 (5x5, pad=2): one K-concatenated banded-Toeplitz matmul ----
    xp = x_ref[...].astype(f32)                                        # (R1, 32)
    l1 = jnp.concatenate([shift_rows(xp, kh) for kh in range(5)], axis=1)  # (R1, 160)
    y1 = sigmoid(mxu(l1, r1_ref) + b1_ref[...])                        # (R1, 168)

    # ---- avg-pool 2x2: columns via packed 0.5-matrix, rows via roll-add + stride-2 read
    c1 = mxu(y1, q1_ref)                                               # (R1, 84)
    s1_ref[...] = 0.5 * (c1 + shift_rows(c1, 1))
    a1 = s1_ref[pl.ds(0, R2, stride=2), :]                             # (R2, 84); rows 0..13/band valid

    # ---- conv2 (5x5, valid) on 6x(14x14) maps, same K-concat trick ----
    l2 = jnp.concatenate([shift_rows(a1, kh) for kh in range(5)], axis=1)  # (R2, 420)
    y2 = sigmoid(mxu(l2, r2_ref) + b2_ref[...])                        # (R2, 160)

    c2 = mxu(y2, q2_ref)                                               # (R2, 80)
    s2_ref[...] = 0.5 * (c2 + shift_rows(c2, 1))
    a2 = s2_ref[pl.ds(0, R3, stride=2), :]                             # (R3, 80); rows 0..4/band valid

    # ---- fc1: torch NCHW-flatten is folded into the packed (400,120) RHS ----
    lf = jnp.concatenate([shift_rows(a2, p) for p in range(5)], axis=1)    # (R3, 400)
    s3_ref[...] = sigmoid(mxu(lf, wf1_ref) + bf1_ref[...])             # (R3, 120); band row 0 valid
    h = s3_ref[pl.ds(0, tb, stride=8), :]                              # (tb, 120)

    # ---- fc2 + sigmoid, fc3 (logits padded to 128 lanes -> lane-dense store) ----
    h = sigmoid(mxu(h, wf2_ref) + bf2_ref[...])                        # (tb, 84)
    o_ref[...] = mxu(h, wf3_ref) + bf3_ref[...]                        # (tb, 128)


# ----------------------------------------------------------------------------
# One-time host-side parameter packing (layout prep, no runtime compute).
# ----------------------------------------------------------------------------
_WEIGHT_ORDER = ("R1", "b1", "Q1", "R2", "b2", "Q2",
                 "Wf1", "bf1", "Wf2", "bf2", "Wf3", "bf3")


def pack_params(params):
    w1 = np.asarray(params["conv1_w"], np.float32)    # (6,1,5,5)
    b1 = np.asarray(params["conv1_b"], np.float32)
    w2 = np.asarray(params["conv2_w"], np.float32)    # (16,6,5,5)
    b2 = np.asarray(params["conv2_b"], np.float32)
    f1w = np.asarray(params["fc1_w"], np.float32)     # (120,400)
    f1b = np.asarray(params["fc1_b"], np.float32)
    f2w = np.asarray(params["fc2_w"], np.float32)     # (84,120)
    f2b = np.asarray(params["fc2_b"], np.float32)
    f3w = np.asarray(params["fc3_w"], np.float32)     # (10,84)
    f3b = np.asarray(params["fc3_b"], np.float32)

    # conv1: K-concat banded RHS.  R1[kh*32 + c, co*28 + j] = w1[co,0,kh,c-j]
    R1 = np.zeros((5, 32, 6 * 28), np.float32)
    for co in range(6):
        for kh in range(5):
            for kw in range(5):
                for j in range(28):
                    R1[kh, j + kw, co * 28 + j] = w1[co, 0, kh, kw]
    R1 = R1.reshape(5 * 32, 6 * 28)
    b1r = np.repeat(b1, 28)[None, :]                  # (1, 168)

    # stage-1 per-channel column pooling: (168 -> 84), 0.5 weights
    Q1 = np.zeros((6 * 28, 6 * 14), np.float32)
    for co in range(6):
        for q in range(14):
            Q1[co * 28 + 2 * q, co * 14 + q] = 0.5
            Q1[co * 28 + 2 * q + 1, co * 14 + q] = 0.5

    # conv2: R2[kh*84 + ci*14 + c, co*10 + j] = w2[co,ci,kh,c-j]
    R2 = np.zeros((5, 6 * 14, 16 * 10), np.float32)
    for co in range(16):
        for ci in range(6):
            for kh in range(5):
                for kw in range(5):
                    for j in range(10):
                        R2[kh, ci * 14 + j + kw, co * 10 + j] = w2[co, ci, kh, kw]
    R2 = R2.reshape(5 * 84, 16 * 10)
    b2r = np.repeat(b2, 10)[None, :]                  # (1, 160)

    # stage-2 per-channel column pooling: (160 -> 80)
    Q2 = np.zeros((16 * 10, 16 * 5), np.float32)
    for co in range(16):
        for q in range(5):
            Q2[co * 10 + 2 * q, co * 5 + q] = 0.5
            Q2[co * 10 + 2 * q + 1, co * 5 + q] = 0.5

    # fc1: torch NCHW flatten index (co*25 + i*5 + j) folded into a (5*80, 120) RHS
    Wf1 = np.zeros((5, 16 * 5, 120), np.float32)
    for p in range(5):
        for co in range(16):
            for q in range(5):
                Wf1[p, co * 5 + q, :] = f1w[:, co * 25 + p * 5 + q]
    Wf1 = Wf1.reshape(5 * 80, 120)

    Wf2 = np.ascontiguousarray(f2w.T)                 # (120, 84)
    Wf3 = np.zeros((84, 128), np.float32)             # pad logits to 128 lanes
    Wf3[:, :10] = f3w.T
    bf3 = np.zeros((1, 128), np.float32)
    bf3[0, :10] = f3b

    bf16, f32 = jnp.bfloat16, jnp.float32
    return {
        "R1": jnp.asarray(R1, bf16), "b1": jnp.asarray(b1r, f32),
        "Q1": jnp.asarray(Q1, bf16),
        "R2": jnp.asarray(R2, bf16), "b2": jnp.asarray(b2r, f32),
        "Q2": jnp.asarray(Q2, bf16),
        "Wf1": jnp.asarray(Wf1, bf16), "bf1": jnp.asarray(f1b[None, :], f32),
        "Wf2": jnp.asarray(Wf2, bf16), "bf2": jnp.asarray(f2b[None, :], f32),
        "Wf3": jnp.asarray(Wf3, bf16), "bf3": jnp.asarray(bf3, f32),
    }


# ----------------------------------------------------------------------------
# Forward wrapper: one fused pallas_call, grid over batch tiles of Tb images.
# ----------------------------------------------------------------------------
def _resident_spec(arr):
    """Full-array block with a constant index map -> stays resident in VMEM."""
    zero = (0,) * arr.ndim
    return pl.BlockSpec(arr.shape, lambda b, _z=zero: _z)


def lenet5_forward(x, packed, tb=None):
    x = jnp.asarray(x, jnp.float32).reshape(-1, 1, 28, 28)   # matches X.view(-1,1,28,28)
    B = x.shape[0]
    if tb is None:
        tb = 64 if B >= 64 else B                            # Tb sized for v7x's 64 MiB VMEM
    Bp = ((B + tb - 1) // tb) * tb                           # pad batch to a multiple of tb
    # (8,128) tiling of the (tb, 128) output block:
    assert tb % 8 == 0 or Bp == tb, "tb must be a multiple of 8 (or cover the whole batch)"

    # Pad 28x28 -> 32x32 (conv1 padding=2; also isolates images in the row-stacked
    # layout) and cast to bf16 to halve input DMA bytes, then stack images as rows.
    xb = x[:, 0].astype(jnp.bfloat16)
    xp = jnp.pad(xb, ((0, Bp - B), (2, 2), (2, 2)))          # (Bp, 32, 32) bf16
    xrows = xp.reshape(Bp * 32, 32)

    weights = [packed[k] for k in _WEIGHT_ORDER]
    in_specs = [pl.BlockSpec((tb * 32, 32), lambda b: (b, 0))]
    in_specs += [_resident_spec(w) for w in weights]

    out = pl.pallas_call(
        functools.partial(_lenet5_kernel, tb),
        out_shape=jax.ShapeDtypeStruct((Bp, 128), jnp.float32),
        grid=(Bp // tb,),
        in_specs=in_specs,
        out_specs=pl.BlockSpec((tb, 128), lambda b: (b, 0)),
        scratch_shapes=[
            pltpu.VMEM((tb * 32, 84), jnp.float32),          # pool-1 row staging
            pltpu.VMEM((tb * 16, 80), jnp.float32),          # pool-2 row staging
            pltpu.VMEM((tb * 8, 120), jnp.float32),          # fc1 row staging
        ],
        compiler_params=pltpu.CompilerParams(
            dimension_semantics=("parallel",)),              # batch tiles independent
    )(xrows, *weights)
    return out[:B, :10]


# ----------------------------------------------------------------------------
# Parameters (same shapes as the PyTorch module) and a float64 numpy reference.
# ----------------------------------------------------------------------------
def init_params(key):
    ks = jax.random.split(key, 10)
    s = 0.1
    return {
        "conv1_w": jax.random.normal(ks[0], (6, 1, 5, 5), jnp.float32) * s,
        "conv1_b": jax.random.normal(ks[1], (6,), jnp.float32) * s,
        "conv2_w": jax.random.normal(ks[2], (16, 6, 5, 5), jnp.float32) * s,
        "conv2_b": jax.random.normal(ks[3], (16,), jnp.float32) * s,
        "fc1_w": jax.random.normal(ks[4], (120, 400), jnp.float32) * s,
        "fc1_b": jax.random.normal(ks[5], (120,), jnp.float32) * s,
        "fc2_w": jax.random.normal(ks[6], (84, 120), jnp.float32) * s,
        "fc2_b": jax.random.normal(ks[7], (84,), jnp.float32) * s,
        "fc3_w": jax.random.normal(ks[8], (10, 84), jnp.float32) * s,
        "fc3_b": jax.random.normal(ks[9], (10,), jnp.float32) * s,
    }


def _reference_forward(x, params):
    """Pure numpy float64 reference of the PyTorch module semantics."""
    x = np.asarray(x, np.float64).reshape(-1, 1, 28, 28)
    w1 = np.asarray(params["conv1_w"], np.float64); b1 = np.asarray(params["conv1_b"], np.float64)
    w2 = np.asarray(params["conv2_w"], np.float64); b2 = np.asarray(params["conv2_b"], np.float64)
    f1w = np.asarray(params["fc1_w"], np.float64); f1b = np.asarray(params["fc1_b"], np.float64)
    f2w = np.asarray(params["fc2_w"], np.float64); f2b = np.asarray(params["fc2_b"], np.float64)
    f3w = np.asarray(params["fc3_w"], np.float64); f3b = np.asarray(params["fc3_b"], np.float64)

    def conv2d(a, w, b, pad):
        B, _, H, W = a.shape
        Co, _, K, _ = w.shape
        ap = np.pad(a, ((0, 0), (0, 0), (pad, pad), (pad, pad)))
        Ho, Wo = H + 2 * pad - K + 1, W + 2 * pad - K + 1
        out = np.zeros((B, Co, Ho, Wo))
        for kh in range(K):
            for kw in range(K):
                out += np.einsum("bchw,oc->bohw",
                                 ap[:, :, kh:kh + Ho, kw:kw + Wo], w[:, :, kh, kw])
        return out + b[None, :, None, None]

    def sig(v):
        return 1.0 / (1.0 + np.exp(-v))

    def pool(v):
        B, C, H, W = v.shape
        return v.reshape(B, C, H // 2, 2, W // 2, 2).mean(axis=(3, 5))

    y = pool(sig(conv2d(x, w1, b1, 2)))
    y = pool(sig(conv2d(y, w2, b2, 0)))
    y = y.reshape(y.shape[0], -1)
    y = sig(y @ f1w.T + f1b)
    y = sig(y @ f2w.T + f2b)
    return y @ f3w.T + f3b


if __name__ == "__main__":
    key = jax.random.PRNGKey(0)
    k_x, k_x2, k_p = jax.random.split(key, 3)
    params = init_params(k_p)
    packed = pack_params(params)

    # Small batch (single grid step, tb == batch).
    x = jax.random.normal(k_x, (2, 1, 28, 28), jnp.float32)
    out = jax.block_until_ready(lenet5_forward(x, packed))
    assert out.shape == (2, 10) and out.dtype == jnp.float32
    ref = _reference_forward(x, params)
    err = float(np.max(np.abs(np.asarray(out, np.float64) - ref)))
    assert err < 3e-2, f"kernel/reference mismatch, max abs err = {err}"

    # Multi-step grid + batch-padding path (B=10, Tb=8 -> 2 grid steps).
    x2 = jax.random.normal(k_x2, (10, 1, 28, 28), jnp.float32)
    out2 = jax.block_until_ready(lenet5_forward(x2, packed, tb=8))
    assert out2.shape == (10, 10)
    ref2 = _reference_forward(x2, params)
    err2 = float(np.max(np.abs(np.asarray(out2, np.float64) - ref2)))
    assert err2 < 3e-2, f"kernel/reference mismatch (tiled), max abs err = {err2}"

    print("KERNEL_OK")
</pallas_src>

<mosaic_0001>
module attributes {stable_mosaic.version = 11 : i64} {
  func.func @_lenet5_kernel(%arg0: i32, %arg1: memref<64x32xbf16, #tpu.memory_space<vmem>>, %arg2: memref<160x168xbf16, #tpu.memory_space<vmem>>, %arg3: memref<1x168xf32, #tpu.memory_space<vmem>>, %arg4: memref<168x84xbf16, #tpu.memory_space<vmem>>, %arg5: memref<420x160xbf16, #tpu.memory_space<vmem>>, %arg6: memref<1x160xf32, #tpu.memory_space<vmem>>, %arg7: memref<160x80xbf16, #tpu.memory_space<vmem>>, %arg8: memref<400x120xbf16, #tpu.memory_space<vmem>>, %arg9: memref<1x120xf32, #tpu.memory_space<vmem>>, %arg10: memref<120x84xbf16, #tpu.memory_space<vmem>>, %arg11: memref<1x84xf32, #tpu.memory_space<vmem>>, %arg12: memref<84x128xbf16, #tpu.memory_space<vmem>>, %arg13: memref<1x128xf32, #tpu.memory_space<vmem>>, %arg14: memref<2x128xf32, #tpu.memory_space<vmem>>, %arg15: memref<64x84xf32, #tpu.memory_space<vmem>>, %arg16: memref<32x80xf32, #tpu.memory_space<vmem>>, %arg17: memref<16x120xf32, #tpu.memory_space<vmem>>) attributes {dimension_semantics = [#tpu.dimension_semantics<parallel>], iteration_bounds = array<i64: 1>, scalar_prefetch = 0 : i64, scratch_operands = 3 : i64, tpu.core_type = #tpu.core_type<tc>, window_params = [{transform_indices = @transform_0, window_bounds = array<i64: 64, 32>}, {pipeline_mode = #tpu.pipeline_mode<synchronous>, transform_indices = @transform_1, window_bounds = array<i64: 160, 168>}, {pipeline_mode = #tpu.pipeline_mode<synchronous>, transform_indices = @transform_2, window_bounds = array<i64: 1, 168>}, {pipeline_mode = #tpu.pipeline_mode<synchronous>, transform_indices = @transform_3, window_bounds = array<i64: 168, 84>}, {pipeline_mode = #tpu.pipeline_mode<synchronous>, transform_indices = @transform_4, window_bounds = array<i64: 420, 160>}, {pipeline_mode = #tpu.pipeline_mode<synchronous>, transform_indices = @transform_5, window_bounds = array<i64: 1, 160>}, {pipeline_mode = #tpu.pipeline_mode<synchronous>, transform_indices = @transform_6, window_bounds = array<i64: 160, 80>}, {pipeline_mode = #tpu.pipeline_mode<synchronous>, transform_indices = @transform_7, window_bounds = array<i64: 400, 120>}, {pipeline_mode = #tpu.pipeline_mode<synchronous>, transform_indices = @transform_8, window_bounds = array<i64: 1, 120>}, {pipeline_mode = #tpu.pipeline_mode<synchronous>, transform_indices = @transform_9, window_bounds = array<i64: 120, 84>}, {pipeline_mode = #tpu.pipeline_mode<synchronous>, transform_indices = @transform_10, window_bounds = array<i64: 1, 84>}, {pipeline_mode = #tpu.pipeline_mode<synchronous>, transform_indices = @transform_11, window_bounds = array<i64: 84, 128>}, {pipeline_mode = #tpu.pipeline_mode<synchronous>, transform_indices = @transform_12, window_bounds = array<i64: 1, 128>}, {transform_indices = @transform_13, window_bounds = array<i64: 2, 128>}]} {
    %c0 = arith.constant 0 : index
    %c0_0 = arith.constant 0 : index
    %0 = vector.load %arg1[%c0, %c0_0] : memref<64x32xbf16, #tpu.memory_space<vmem>>, vector<64x32xbf16>
    %1 = arith.extf %0 : vector<64x32xbf16> to vector<64x32xf32>
    %c63_i32 = arith.constant 63 : i32
    %2 = tpu.dynamic_rotate %1 by %c63_i32 dim 0 : vector<64x32xf32>, i32 -> vector<64x32xf32>
    %c62_i32 = arith.constant 62 : i32
    %3 = tpu.dynamic_rotate %1 by %c62_i32 dim 0 : vector<64x32xf32>, i32 -> vector<64x32xf32>
    %c61_i32 = arith.constant 61 : i32
    %4 = tpu.dynamic_rotate %1 by %c61_i32 dim 0 : vector<64x32xf32>, i32 -> vector<64x32xf32>
    %c60_i32 = arith.constant 60 : i32
    %5 = tpu.dynamic_rotate %1 by %c60_i32 dim 0 : vector<64x32xf32>, i32 -> vector<64x32xf32>
    %6 = tpu.concatenate %1, %2, %3, %4, %5 in 1 : vector<64x32xf32>, vector<64x32xf32>, vector<64x32xf32>, vector<64x32xf32>, vector<64x32xf32> -> vector<64x160xf32>
    %7 = arith.truncf %6 : vector<64x160xf32> to vector<64x160xbf16>
    %c0_1 = arith.constant 0 : index
    %c0_2 = arith.constant 0 : index
    %8 = vector.load %arg2[%c0_1, %c0_2] : memref<160x168xbf16, #tpu.memory_space<vmem>>, vector<160x168xbf16>
    %cst = arith.constant dense<0.000000e+00> : vector<64x168xf32>
    %9 = tpu.matmul %7, %8, %cst {dimension_numbers = #tpu.dot_dimension_numbers<[1], [0], [0], [1], [0, 0, 1, 1], [], []>} : vector<64x160xbf16>, vector<160x168xbf16>, vector<64x168xf32> -> vector<64x168xf32>
    %c0_3 = arith.constant 0 : index
    %c0_4 = arith.constant 0 : index
    %10 = vector.load %arg3[%c0_3, %c0_4] : memref<1x168xf32, #tpu.memory_space<vmem>>, vector<1x168xf32>
    %11 = vector.broadcast %10 : vector<1x168xf32> to vector<64x168xf32>
    %12 = arith.addf %9, %11 : vector<64x168xf32>
    %cst_5 = arith.constant 5.000000e-01 : f32
    %13 = vector.broadcast %cst_5 : f32 to vector<64x168xf32>
    %14 = arith.mulf %13, %12 : vector<64x168xf32>
    %15 = math.tanh %14 : vector<64x168xf32>
    %cst_6 = arith.constant 5.000000e-01 : f32
    %16 = vector.broadcast %cst_6 : f32 to vector<64x168xf32>
    %17 = arith.mulf %16, %15 : vector<64x168xf32>
    %cst_7 = arith.constant 5.000000e-01 : f32
    %18 = vector.broadcast %cst_7 : f32 to vector<64x168xf32>
    %19 = arith.addf %17, %18 : vector<64x168xf32>
    %20 = arith.truncf %19 : vector<64x168xf32> to vector<64x168xbf16>
    %c0_8 = arith.constant 0 : index
    %c0_9 = arith.constant 0 : index
    %21 = vector.load %arg4[%c0_8, %c0_9] : memref<168x84xbf16, #tpu.memory_space<vmem>>, vector<168x84xbf16>
    %cst_10 = arith.constant dense<0.000000e+00> : vector<64x84xf32>
    %22 = tpu.matmul %20, %21, %cst_10 {dimension_numbers = #tpu.dot_dimension_numbers<[1], [0], [0], [1], [0, 0, 1, 1], [], []>} : vector<64x168xbf16>, vector<168x84xbf16>, vector<64x84xf32> -> vector<64x84xf32>
    %c63_i32_11 = arith.constant 63 : i32
    %23 = tpu.dynamic_rotate %22 by %c63_i32_11 dim 0 : vector<64x84xf32>, i32 -> vector<64x84xf32>
    %24 = arith.addf %22, %23 : vector<64x84xf32>
    %cst_12 = arith.constant 5.000000e-01 : f32
    %25 = vector.broadcast %cst_12 : f32 to vector<64x84xf32>
    %26 = arith.mulf %25, %24 : vector<64x84xf32>
    %c0_13 = arith.constant 0 : index
    %c0_14 = arith.constant 0 : index
    %27 = vector.load %arg15[%c0_13, %c0_14] : memref<64x84xf32, #tpu.memory_space<vmem>>, vector<64x84xf32>
    tpu.vector_store %arg15[%c0_13, %c0_14], %26 {strides = array<i32>} : memref<64x84xf32, #tpu.memory_space<vmem>>, vector<64x84xf32>,
    %c0_15 = arith.constant 0 : index
    %c0_16 = arith.constant 0 : index
    %28 = tpu.strided_load %arg15[%c0_15, %c0_16] {strides = array<i32: 2, 1>} : memref<64x84xf32, #tpu.memory_space<vmem>>, vector<32x84xf32>
    %c31_i32 = arith.constant 31 : i32
    %29 = tpu.dynamic_rotate %28 by %c31_i32 dim 0 : vector<32x84xf32>, i32 -> vector<32x84xf32>
    %c30_i32 = arith.constant 30 : i32
    %30 = tpu.dynamic_rotate %28 by %c30_i32 dim 0 : vector<32x84xf32>, i32 -> vector<32x84xf32>
    %c29_i32 = arith.constant 29 : i32
    %31 = tpu.dynamic_rotate %28 by %c29_i32 dim 0 : vector<32x84xf32>, i32 -> vector<32x84xf32>
    %c28_i32 = arith.constant 28 : i32
    %32 = tpu.dynamic_rotate %28 by %c28_i32 dim 0 : vector<32x84xf32>, i32 -> vector<32x84xf32>
    %33 = tpu.concatenate %28, %29, %30, %31, %32 in 1 : vector<32x84xf32>, vector<32x84xf32>, vector<32x84xf32>, vector<32x84xf32>, vector<32x84xf32> -> vector<32x420xf32>
    %34 = arith.truncf %33 : vector<32x420xf32> to vector<32x420xbf16>
    %c0_17 = arith.constant 0 : index
    %c0_18 = arith.constant 0 : index
    %35 = vector.load %arg5[%c0_17, %c0_18] : memref<420x160xbf16, #tpu.memory_space<vmem>>, vector<420x160xbf16>
    %cst_19 = arith.constant dense<0.000000e+00> : vector<32x160xf32>
    %36 = tpu.matmul %34, %35, %cst_19 {dimension_numbers = #tpu.dot_dimension_numbers<[1], [0], [0], [1], [0, 0, 1, 1], [], []>} : vector<32x420xbf16>, vector<420x160xbf16>, vector<32x160xf32> -> vector<32x160xf32>
    %c0_20 = arith.constant 0 : index
    %c0_21 = arith.constant 0 : index
    %37 = vector.load %arg6[%c0_20, %c0_21] : memref<1x160xf32, #tpu.memory_space<vmem>>, vector<1x160xf32>
    %38 = vector.broadcast %37 : vector<1x160xf32> to vector<32x160xf32>
    %39 = arith.addf %36, %38 : vector<32x160xf32>
    %cst_22 = arith.constant 5.000000e-01 : f32
    %40 = vector.broadcast %cst_22 : f32 to vector<32x160xf32>
    %41 = arith.mulf %40, %39 : vector<32x160xf32>
    %42 = math.tanh %41 : vector<32x160xf32>
    %cst_23 = arith.constant 5.000000e-01 : f32
    %43 = vector.broadcast %cst_23 : f32 to vector<32x160xf32>
    %44 = arith.mulf %43, %42 : vector<32x160xf32>
    %cst_24 = arith.constant 5.000000e-01 : f32
    %45 = vector.broadcast %cst_24 : f32 to vector<32x160xf32>
    %46 = arith.addf %44, %45 : vector<32x160xf32>
    %47 = arith.truncf %46 : vector<32x160xf32> to vector<32x160xbf16>
    %c0_25 = arith.constant 0 : index
    %c0_26 = arith.constant 0 : index
    %48 = vector.load %arg7[%c0_25, %c0_26] : memref<160x80xbf16, #tpu.memory_space<vmem>>, vector<160x80xbf16>
    %cst_27 = arith.constant dense<0.000000e+00> : vector<32x80xf32>
    %49 = tpu.matmul %47, %48, %cst_27 {dimension_numbers = #tpu.dot_dimension_numbers<[1], [0], [0], [1], [0, 0, 1, 1], [], []>} : vector<32x160xbf16>, vector<160x80xbf16>, vector<32x80xf32> -> vector<32x80xf32>
    %c31_i32_28 = arith.constant 31 : i32
    %50 = tpu.dynamic_rotate %49 by %c31_i32_28 dim 0 : vector<32x80xf32>, i32 -> vector<32x80xf32>
    %51 = arith.addf %49, %50 : vector<32x80xf32>
    %cst_29 = arith.constant 5.000000e-01 : f32
    %52 = vector.broadcast %cst_29 : f32 to vector<32x80xf32>
    %53 = arith.mulf %52, %51 : vector<32x80xf32>
    %c0_30 = arith.constant 0 : index
    %c0_31 = arith.constant 0 : index
    %54 = vector.load %arg16[%c0_30, %c0_31] : memref<32x80xf32, #tpu.memory_space<vmem>>, vector<32x80xf32>
    tpu.vector_store %arg16[%c0_30, %c0_31], %53 {strides = array<i32>} : memref<32x80xf32, #tpu.memory_space<vmem>>, vector<32x80xf32>,
    %c0_32 = arith.constant 0 : index
    %c0_33 = arith.constant 0 : index
    %55 = tpu.strided_load %arg16[%c0_32, %c0_33] {strides = array<i32: 2, 1>} : memref<32x80xf32, #tpu.memory_space<vmem>>, vector<16x80xf32>
    %c15_i32 = arith.constant 15 : i32
    %56 = tpu.dynamic_rotate %55 by %c15_i32 dim 0 : vector<16x80xf32>, i32 -> vector<16x80xf32>
    %c14_i32 = arith.constant 14 : i32
    %57 = tpu.dynamic_rotate %55 by %c14_i32 dim 0 : vector<16x80xf32>, i32 -> vector<16x80xf32>
    %c13_i32 = arith.constant 13 : i32
    %58 = tpu.dynamic_rotate %55 by %c13_i32 dim 0 : vector<16x80xf32>, i32 -> vector<16x80xf32>
    %c12_i32 = arith.constant 12 : i32
    %59 = tpu.dynamic_rotate %55 by %c12_i32 dim 0 : vector<16x80xf32>, i32 -> vector<16x80xf32>
    %60 = tpu.concatenate %55, %56, %57, %58, %59 in 1 : vector<16x80xf32>, vector<16x80xf32>, vector<16x80xf32>, vector<16x80xf32>, vector<16x80xf32> -> vector<16x400xf32>
    %61 = arith.truncf %60 : vector<16x400xf32> to vector<16x400xbf16>
    %c0_34 = arith.constant 0 : index
    %c0_35 = arith.constant 0 : index
    %62 = vector.load %arg8[%c0_34, %c0_35] : memref<400x120xbf16, #tpu.memory_space<vmem>>, vector<400x120xbf16>
    %cst_36 = arith.constant dense<0.000000e+00> : vector<16x120xf32>
    %63 = tpu.matmul %61, %62, %cst_36 {dimension_numbers = #tpu.dot_dimension_numbers<[1], [0], [0], [1], [0, 0, 1, 1], [], []>} : vector<16x400xbf16>, vector<400x120xbf16>, vector<16x120xf32> -> vector<16x120xf32>
    %c0_37 = arith.constant 0 : index
    %c0_38 = arith.constant 0 : index
    %64 = vector.load %arg9[%c0_37, %c0_38] : memref<1x120xf32, #tpu.memory_space<vmem>>, vector<1x120xf32>
    %65 = vector.broadcast %64 : vector<1x120xf32> to vector<16x120xf32>
    %66 = arith.addf %63, %65 : vector<16x120xf32>
    %cst_39 = arith.constant 5.000000e-01 : f32
    %67 = vector.broadcast %cst_39 : f32 to vector<16x120xf32>
    %68 = arith.mulf %67, %66 : vector<16x120xf32>
    %69 = math.tanh %68 : vector<16x120xf32>
    %cst_40 = arith.constant 5.000000e-01 : f32
    %70 = vector.broadcast %cst_40 : f32 to vector<16x120xf32>
    %71 = arith.mulf %70, %69 : vector<16x120xf32>
    %cst_41 = arith.constant 5.000000e-01 : f32
    %72 = vector.broadcast %cst_41 : f32 to vector<16x120xf32>
    %73 = arith.addf %71, %72 : vector<16x120xf32>
    %c0_42 = arith.constant 0 : index
    %c0_43 = arith.constant 0 : index
    %74 = vector.load %arg17[%c0_42, %c0_43] : memref<16x120xf32, #tpu.memory_space<vmem>>, vector<16x120xf32>
    tpu.vector_store %arg17[%c0_42, %c0_43], %73 {strides = array<i32>} : memref<16x120xf32, #tpu.memory_space<vmem>>, vector<16x120xf32>,
    %c0_44 = arith.constant 0 : index
    %c0_45 = arith.constant 0 : index
    %75 = tpu.strided_load %arg17[%c0_44, %c0_45] {strides = array<i32: 8, 1>} : memref<16x120xf32, #tpu.memory_space<vmem>>, vector<2x120xf32>
    %76 = arith.truncf %75 : vector<2x120xf32> to vector<2x120xbf16>
    %c0_46 = arith.constant 0 : index
    %c0_47 = arith.constant 0 : index
    %77 = vector.load %arg10[%c0_46, %c0_47] : memref<120x84xbf16, #tpu.memory_space<vmem>>, vector<120x84xbf16>
    %cst_48 = arith.constant dense<0.000000e+00> : vector<2x84xf32>
    %78 = tpu.matmul %76, %77, %cst_48 {dimension_numbers = #tpu.dot_dimension_numbers<[1], [0], [0], [1], [0, 0, 1, 1], [], []>} : vector<2x120xbf16>, vector<120x84xbf16>, vector<2x84xf32> -> vector<2x84xf32>
    %c0_49 = arith.constant 0 : index
    %c0_50 = arith.constant 0 : index
    %79 = vector.load %arg11[%c0_49, %c0_50] : memref<1x84xf32, #tpu.memory_space<vmem>>, vector<1x84xf32>
    %80 = vector.broadcast %79 : vector<1x84xf32> to vector<2x84xf32>
    %81 = arith.addf %78, %80 : vector<2x84xf32>
    %cst_51 = arith.constant 5.000000e-01 : f32
    %82 = vector.broadcast %cst_51 : f32 to vector<2x84xf32>
    %83 = arith.mulf %82, %81 : vector<2x84xf32>
    %84 = math.tanh %83 : vector<2x84xf32>
    %cst_52 = arith.constant 5.000000e-01 : f32
    %85 = vector.broadcast %cst_52 : f32 to vector<2x84xf32>
    %86 = arith.mulf %85, %84 : vector<2x84xf32>
    %cst_53 = arith.constant 5.000000e-01 : f32
    %87 = vector.broadcast %cst_53 : f32 to vector<2x84xf32>
    %88 = arith.addf %86, %87 : vector<2x84xf32>
    %89 = arith.truncf %88 : vector<2x84xf32> to vector<2x84xbf16>
    %c0_54 = arith.constant 0 : index
    %c0_55 = arith.constant 0 : index
    %90 = vector.load %arg12[%c0_54, %c0_55] : memref<84x128xbf16, #tpu.memory_space<vmem>>, vector<84x128xbf16>
    %cst_56 = arith.constant dense<0.000000e+00> : vector<2x128xf32>
    %91 = tpu.matmul %89, %90, %cst_56 {dimension_numbers = #tpu.dot_dimension_numbers<[1], [0], [0], [1], [0, 0, 1, 1], [], []>} : vector<2x84xbf16>, vector<84x128xbf16>, vector<2x128xf32> -> vector<2x128xf32>
    %c0_57 = arith.constant 0 : index
    %c0_58 = arith.constant 0 : index
    %92 = vector.load %arg13[%c0_57, %c0_58] : memref<1x128xf32, #tpu.memory_space<vmem>>, vector<1x128xf32>
    %93 = vector.broadcast %92 : vector<1x128xf32> to vector<2x128xf32>
    %94 = arith.addf %91, %93 : vector<2x128xf32>
    %c0_59 = arith.constant 0 : index
    %c0_60 = arith.constant 0 : index
    %95 = vector.load %arg14[%c0_59, %c0_60] : memref<2x128xf32, #tpu.memory_space<vmem>>, vector<2x128xf32>
    tpu.vector_store %arg14[%c0_59, %c0_60], %94 {strides = array<i32>} : memref<2x128xf32, #tpu.memory_space<vmem>>, vector<2x128xf32>,
    return
  }
  func.func @transform_0(%arg0: i32) -> (i32, i32) {
    %c0_i32 = arith.constant 0 : i32
    %c0_i32_0 = arith.constant 0 : i32
    return %arg0, %c0_i32 : i32, i32
  }
  func.func @transform_1(%arg0: i32) -> (i32, i32) {
    %c0_i32 = arith.constant 0 : i32
    %c0_i32_0 = arith.constant 0 : i32
    %c0_i32_1 = arith.constant 0 : i32
    return %c0_i32, %c0_i32_0 : i32, i32
  }
  func.func @transform_2(%arg0: i32) -> (i32, i32) {
    %c0_i32 = arith.constant 0 : i32
    %c0_i32_0 = arith.constant 0 : i32
    %c0_i32_1 = arith.constant 0 : i32
    return %c0_i32, %c0_i32_0 : i32, i32
  }
  func.func @transform_3(%arg0: i32) -> (i32, i32) {
    %c0_i32 = arith.constant 0 : i32
    %c0_i32_0 = arith.constant 0 : i32
    %c0_i32_1 = arith.constant 0 : i32
    return %c0_i32, %c0_i32_0 : i32, i32
  }
  func.func @transform_4(%arg0: i32) -> (i32, i32) {
    %c0_i32 = arith.constant 0 : i32
    %c0_i32_0 = arith.constant 0 : i32
    %c0_i32_1 = arith.constant 0 : i32
    return %c0_i32, %c0_i32_0 : i32, i32
  }
  func.func @transform_5(%arg0: i32) -> (i32, i32) {
    %c0_i32 = arith.constant 0 : i32
    %c0_i32_0 = arith.constant 0 : i32
    %c0_i32_1 = arith.constant 0 : i32
    return %c0_i32, %c0_i32_0 : i32, i32
  }
  func.func @transform_6(%arg0: i32) -> (i32, i32) {
    %c0_i32 = arith.constant 0 : i32
    %c0_i32_0 = arith.constant 0 : i32
    %c0_i32_1 = arith.constant 0 : i32
    return %c0_i32, %c0_i32_0 : i32, i32
  }
  func.func @transform_7(%arg0: i32) -> (i32, i32) {
    %c0_i32 = arith.constant 0 : i32
    %c0_i32_0 = arith.constant 0 : i32
    %c0_i32_1 = arith.constant 0 : i32
    return %c0_i32, %c0_i32_0 : i32, i32
  }
  func.func @transform_8(%arg0: i32) -> (i32, i32) {
    %c0_i32 = arith.constant 0 : i32
    %c0_i32_0 = arith.constant 0 : i32
    %c0_i32_1 = arith.constant 0 : i32
    return %c0_i32, %c0_i32_0 : i32, i32
  }
  func.func @transform_9(%arg0: i32) -> (i32, i32) {
    %c0_i32 = arith.constant 0 : i32
    %c0_i32_0 = arith.constant 0 : i32
    %c0_i32_1 = arith.constant 0 : i32
    return %c0_i32, %c0_i32_0 : i32, i32
  }
  func.func @transform_10(%arg0: i32) -> (i32, i32) {
    %c0_i32 = arith.constant 0 : i32
    %c0_i32_0 = arith.constant 0 : i32
    %c0_i32_1 = arith.constant 0 : i32
    return %c0_i32, %c0_i32_0 : i32, i32
  }
  func.func @transform_11(%arg0: i32) -> (i32, i32) {
    %c0_i32 = arith.constant 0 : i32
    %c0_i32_0 = arith.constant 0 : i32
    %c0_i32_1 = arith.constant 0 : i32
    return %c0_i32, %c0_i32_0 : i32, i32
  }
  func.func @transform_12(%arg0: i32) -> (i32, i32) {
    %c0_i32 = arith.constant 0 : i32
    %c0_i32_0 = arith.constant 0 : i32
    %c0_i32_1 = arith.constant 0 : i32
    return %c0_i32, %c0_i32_0 : i32, i32
  }
  func.func @transform_13(%arg0: i32) -> (i32, i32) {
    %c0_i32 = arith.constant 0 : i32
    %c0_i32_0 = arith.constant 0 : i32
    return %arg0, %c0_i32 : i32, i32
  }
}

</mosaic_0001>

<bundles_post_ra>
// kernel: tpu_custom_call.1
= control target key start
LH: loop header
LB: loop body
LE: loop exit
PB: predicated region body
PF: predicated region fallthrough
CT: control target
= control target key end

     0   :  { %v70_v2 = vlaneseq  ;;  %s4133_s0 = inlined_call_operand.vmem [shape: bf16[64,32], index: 0, kind: input, shape index: {}]   ;;  %s4134_s1 = inlined_call_operand.vmem [shape: bf16[160,168], index: 1, kind: input, shape index: {}]   ;;  %s4135_s2 = inlined_call_operand.vmem [shape: f32[1,168], index: 2, kind: input, shape index: {}]   ;;  %s4136_s3 = inlined_call_operand.vmem [shape: bf16[168,84], index: 3, kind: input, shape index: {}]   ;;  %s4137_s4 = inlined_call_operand.vmem [shape: bf16[420,160], index: 4, kind: input, shape index: {}]   ;;  %s4138_s5 = inlined_call_operand.vmem [shape: f32[1,160], index: 5, kind: input, shape index: {}]   ;;  %s4139_s6 = inlined_call_operand.vmem [shape: bf16[160,80], index: 6, kind: input, shape index: {}]   ;;  %s4140_s7 = inlined_call_operand.vmem [shape: bf16[400,120], index: 7, kind: input, shape index: {}]   ;;  %s4141_s8 = inlined_call_operand.vmem [shape: f32[1,120], index: 8, kind: input, shape index: {}]   ;;  %s4142_s9 = inlined_call_operand.vmem [shape: bf16[120,84], index: 9, kind: input, shape index: {}]   ;;  %s4143_s10 = inlined_call_operand.vmem [shape: f32[1,84], index: 10, kind: input, shape index: {}]   ;;  %s4144_s11 = inlined_call_operand.vmem [shape: bf16[84,128], index: 11, kind: input, shape index: {}]   ;;  %s4145_s12 = inlined_call_operand.vmem [shape: f32[1,128], index: 12, kind: input, shape index: {}]   ;;  %s4146_s13 = inlined_call_operand.hbm [shape: f32[2,128], index: 13, kind: output, shape index: {}]  }
   0x1   :  { %v2768_v0 = vld [vmem:[%s4133_s0] sm:$0xff]   ;;  %v2783_v1 = vld [vmem:[%s4133_s0 + $0x8] sm:$0xff]   ;;  %v2784_v3 = vld [vmem:[%s4133_s0 + $0x10] sm:$0xff]  }
   0x2   :  { %v3086_v4 = vunpack.c.l.bf16 %v2768_v0  ;;  %v3088_v5 = vunpack.c.h.bf16 %v2768_v0  ;;  %v3090_v6 = vunpack.c.l.bf16 %v2783_v1  ;;  %v3092_v7 = vunpack.c.h.bf16 %v2783_v1 }
   0x3   :  { %v3094_v8 = vshrl.u32 %v70_v2, 7  ;;  %v3096_v9 = vunpack.c.l.bf16 %v2784_v3 }
   0x4   :  { %18 = vsyncpa [#allocation6], 0  ;;  %v62_v10 = vrot.slane %v3086_v4, 1  ;;  %v63_v11 = vrot.slane %v3088_v5, 1  ;;  %v64_v12 = vrot.slane %v3090_v6, 1  ;;  %v98_v13 = vrot.slane %v3086_v4, 3 }
   0x5   :  { %vm72_vm0 = vcmp.lt.s32.totalorder %v3094_v8, 7  ;;  %v99_v14 = vrot.slane %v3088_v5, 3  ;;  %v100_v15 = vrot.slane %v3090_v6, 3  ;;  %vm106_vm1 = vcmp.lt.s32.totalorder %v3094_v8, 5  ;;  %v2785_v24 = vld [vmem:[%s4133_s0 + $0x18] sm:$0xff]   ;;  %s2998_s16 = smov 32  }
   0x6   :  { %v78_v16 = vsel %vm72_vm0, %v63_v11, %v64_v12  ;;  %v79_v17 = vsel %vm72_vm0, %v62_v10, %v63_v11  ;;  %v81_v18 = vrot.slane %v3086_v4, 2  ;;  %v82_v19 = vrot.slane %v3088_v5, 2  ;;  %s2999_s17 = smov 96   ;;  %s3000_s0 = smov 64   ;;  %v2159_v45 = vld [vmem:[%s4134_s1 + $0x70] sm:$0xf] }
   0x7   :  { %v2795_v20 = vpack.i.bf16 %v78_v16, %v79_v17  ;;  %v112_v21 = vsel %vm106_vm1, %v99_v14, %v100_v15  ;;  %v113_v22 = vsel %vm106_vm1, %v98_v13, %v99_v14  ;;  %v83_v23 = vrot.slane %v3090_v6, 2  ;;  %v2653_v46 = vld [vmem:[%s4134_s1 + $0x74] sm:$0xf0]  ;;  %v2652_v51 = vld [vmem:[%s4134_s1 + $0x74] sm:$0xf]  ;;  %s3001_s30 = smov 124  }
   0x8   :  { %v2805_v25 = vpack.i.bf16 %v112_v21, %v113_v22  ;;  %vm89_vm2 = vcmp.lt.s32.totalorder %v3094_v8, 6  ;;  %v65_v26 = vrot.slane %v3092_v7, 1  ;;  %v66_v27 = vrot.slane %v3096_v9, 1  ;;  %v2161_v54 = vld [vmem:[%s4134_s1 + $0x78] sm:$0xf0]  ;;  %s3002_s14 = smov 40  }
   0x9   :  { %2796 = vrot.lane.b32.xlu0 %v2795_v20, %s2998_s16  ;;  %v84_v28 = vrot.slane %v3092_v7, 2  ;;  %v85_v29 = vrot.slane %v3096_v9, 2  ;;  %v95_v30 = vsel %vm89_vm2, %v82_v19, %v83_v23  ;;  %v96_v31 = vsel %vm89_vm2, %v81_v18, %v82_v19  ;;  %v2151_v55 = vld [vmem:[%s4134_s1 + $0x60] sm:$0xf]  ;;  %v2651_v56 = vld [vmem:[%s4134_s1 + $0x64] sm:$0xf0] }
   0xa   :  { %2806 = vrot.lane.b32.xlu1 %v2805_v25, %s2999_s17  ;;  %v3137_v32 = vunpack.c.h.bf16 %v2784_v3  ;;  %v3139_v33 = vunpack.c.l.bf16 %v2785_v24  ;;  %v76_v34 = vsel %vm72_vm0, %v65_v26, %v66_v27  ;;  %v77_v35 = vsel %vm72_vm0, %v64_v12, %v65_v26  ;;  %v2650_v0 = vld [vmem:[%s4134_s1 + $0x64] sm:$0xf]  ;;  %v2153_v1 = vld [vmem:[%s4134_s1 + $0x68] sm:$0xf0]  ;;  %v2143_v11 = vld [vmem:[%s4134_s1 + $0x50] sm:$0xf] }
   0xb   :  { %v93_v36 = vsel %vm89_vm2, %v84_v28, %v85_v29  ;;  %v94_v37 = vsel %vm89_vm2, %v83_v23, %v84_v28  ;;  %v2800_v39 = vpack.i.bf16 %v95_v30, %v96_v31  ;;  %v101_v40 = vrot.slane %v3092_v7, 3  ;;  %v2649_v12 = vld [vmem:[%s4134_s1 + $0x54] sm:$0xf0]  ;;  %v2648_v23 = vld [vmem:[%s4134_s1 + $0x54] sm:$0xf]  ;;  %s3003_s15 = smov 84  }
   0xc   :  { %v2815_v38 = vpack.i.bf16 %v93_v36, %v94_v37  ;;  %v102_v41 = vrot.slane %v3096_v9, 3  ;;  %v2810_v42 = vpack.i.bf16 %v76_v34, %v77_v35  ;;  %v67_v43 = vrot.slane %v3137_v32, 1  ;;  %v2135_v25 = vld [vmem:[%s4134_s1 + $0x40] sm:$0xf]  ;;  %v2647_v26 = vld [vmem:[%s4134_s1 + $0x44] sm:$0xf0] }
   0xd   :  { %v68_v44 = vrot.slane %v3139_v33, 1  ;;  %v86_v47 = vrot.slane %v3137_v32, 2  ;;  %v87_v48 = vrot.slane %v3139_v33, 2  ;;  %v111_v50 = vsel %vm106_vm1, %v100_v15, %v101_v40  ;;  %v2646_v37 = vld [vmem:[%s4134_s1 + $0x44] sm:$0xf]  ;;  %s3004_s18 = smov 80  }
   0xe   :  { %2816 = vrot.lane.b32.xlu2 %v2815_v38, %s3000_s0  ;;  %v110_v49 = vsel %vm106_vm1, %v101_v40, %v102_v41  ;;  %v3170_v52 = vunpack.c.h.bf16 %v2785_v24  ;;  %v2160_v53 = vor.u32 %v2653_v46, %v2159_v45  ;;  %v75_v58 = vsel %vm72_vm0, %v66_v27, %v67_v43  ;;  %v2145_v24 = vld [vmem:[%s4134_s1 + $0x58] sm:$0xf0]  ;;  %v2127_v38 = vld [vmem:[%s4134_s1 + $0x30] sm:$0xf]  ;;  %v2644_v45 = vld [vmem:[%s4134_s1 + $0x34] sm:$0xf] }
   0xf   :  { %v74_v57 = vsel %vm72_vm0, %v67_v43, %v68_v44  ;;  %v2820_v59 = vpack.i.bf16 %v110_v49, %v111_v50  ;;  %v91_v60 = vsel %vm89_vm2, %v86_v47, %v87_v48  ;;  %v92_v61 = vsel %vm89_vm2, %v85_v29, %v86_v47  ;;  %v2129_v46 = vld [vmem:[%s4134_s1 + $0x38] sm:$0xf0] }
  0x10   :  { %v103_v62 = vrot.slane %v3137_v32, 3  ;;  %v104_v63 = vrot.slane %v3139_v33, 3  ;;  %401 = vmatpush.bf16.msra.mxu0 %v2160_v53  ;;  %v2164_v2 = vor.u32 %v2652_v51, %v2161_v54  ;;  %v2152_v3 = vor.u32 %v2651_v56, %v2151_v55  ;;  %v2177_v49 = vld [vmem:[%s4134_s1 + $0x98] sm:$0xf0]  ;;  %v2119_v51 = vld [vmem:[%s4134_s1 + $0x20] sm:$0xf] }
  0x11   :  { %2801 = vrot.lane.b32.xlu0 %v2800_v39, %s3000_s0  ;;  %v2825_v14 = vpack.i.bf16 %v74_v57, %v75_v58  ;;  %v69_v15 = vrot.slane %v3170_v52, 1  ;;  %v2830_v16 = vpack.i.bf16 %v91_v60, %v92_v61  ;;  %v2156_v17 = vor.u32 %v2650_v0, %v2153_v1  ;;  %v2643_v53 = vld [vmem:[%s4134_s1 + $0x24] sm:$0xf0]  ;;  %v2642_v54 = vld [vmem:[%s4134_s1 + $0x24] sm:$0xf] }
  0x12   :  { %2811 = vrot.lane.b32.xlu1 %v2810_v42, %s2998_s16  ;;  %459 = vmatpush.bf16.msra.mxu2 %v2164_v2  ;;  %v88_v19 = vrot.slane %v3170_v52, 2  ;;  %v108_v20 = vsel %vm106_vm1, %v103_v62, %v104_v63  ;;  %v109_v21 = vsel %vm106_vm1, %v102_v41, %v103_v62  ;;  %v2144_v22 = vor.u32 %v2649_v12, %v2143_v11  ;;  %v2121_v56 = vld [vmem:[%s4134_s1 + $0x28] sm:$0xf0]  ;;  %v2654_v58 = vld [vmem:[%s4134_s1 + $0x84] sm:$0xf] }
  0x13   :  { %v73_v27 = vsel %vm72_vm0, %v68_v44, %v69_v15  ;;  %v80_v28 = vsel %vm72_vm0, %v69_v15, %v62_v10  ;;  %v2835_v29 = vpack.i.bf16 %v108_v20, %v109_v21  ;;  %v2148_v30 = vor.u32 %v2648_v23, %v2145_v24  ;;  %v2137_v10 = vld [vmem:[%s4134_s1 + $0x48] sm:$0xf0]  ;;  %v2111_v60 = vld [vmem:[%s4134_s1 + $0x10] sm:$0xf]  ;;  %v2641_v62 = vld [vmem:[%s4134_s1 + $0x14] sm:$0xf0] }
  0x14   :  { %402 = vmatpush.bf16.msra.mxu0 %v2152_v3  ;;  %v90_v31 = vsel %vm89_vm2, %v87_v48, %v88_v19  ;;  %v97_v34 = vsel %vm89_vm2, %v88_v19, %v81_v18  ;;  %v105_v35 = vrot.slane %v3170_v52, 3  ;;  %v2136_v36 = vor.u32 %v2647_v26, %v2135_v25  ;;  %v2645_v18 = vld [vmem:[%s4134_s1 + $0x34] sm:$0xf0]  ;;  %v2113_v0 = vld [vmem:[%s4134_s1 + $0x18] sm:$0xf0] }
  0x15   :  { %v2840_v39 = vpack.i.bf16 %v80_v28, %v73_v27  ;;  %v2845_v40 = vpack.i.bf16 %v97_v34, %v90_v31  ;;  %v2140_v41 = vor.u32 %v2646_v37, %v2137_v10  ;;  %v2128_v44 = vor.u32 %v2645_v18, %v2127_v38  ;;  %v2175_v15 = vld [vmem:[%s4134_s1 + $0x90] sm:$0xf]  ;;  %v2103_v21 = vld [vmem:[%s4134_s1] sm:$0xf]  ;;  %v2638_v23 = vld [vmem:[%s4134_s1 + $0x4] sm:$0xf] }
  0x16   :  { %2821 = vrot.lane.b32.xlu2 %v2820_v59, %s2999_s17  ;;  %460 = vmatpush.bf16.msra.mxu2 %v2156_v17  ;;  %v107_v42 = vsel %vm106_vm1, %v104_v63, %v105_v35  ;;  %v114_v43 = vsel %vm106_vm1, %v105_v35, %v98_v13  ;;  %v2132_v48 = vor.u32 %v2644_v45, %v2129_v46  ;;  %v2656_v13 = vld [vmem:[%s4134_s1 + $0x94] sm:$0xf]  ;;  %v2169_v59 = vld [vmem:[%s4134_s1 + $0x88] sm:$0xf0]  ;;  %v115_v3 = vrot.slane %v3086_v4, 4 }
  0x17   :  { %v2850_v47 = vpack.i.bf16 %v114_v43, %v107_v42  ;;  %v2180_v50 = vor.u32 %v2656_v13, %v2177_v49  ;;  %v2120_v55 = vor.u32 %v2643_v53, %v2119_v51  ;;  %v2124_v57 = vor.u32 %v2642_v54, %v2121_v56  ;;  %v2640_v63 = vld [vmem:[%s4134_s1 + $0x14] sm:$0xf]  ;;  %v2105_v25 = vld [vmem:[%s4134_s1 + $0x8] sm:$0xf0]  ;;  %v2167_v26 = vld [vmem:[%s4134_s1 + $0x80] sm:$0xf] }
  0x18   :  { %403 = vmatpush.bf16.msra.mxu0 %v2144_v22  ;;  %v2172_v61 = vor.u32 %v2654_v58, %v2169_v59  ;;  %v2112_v1 = vor.u32 %v2641_v62, %v2111_v60  ;;  %v2116_v2 = vor.u32 %v2640_v63, %v2113_v0  ;;  %v116_v11 = vrot.slane %v3088_v5, 4  ;;  %v2639_v22 = vld [vmem:[%s4134_s1 + $0x4] sm:$0xf0] }
  0x19   :  { %2826 = vrot.lane.b32.xlu0 %v2825_v14, %s2998_s16  ;;  %494 = vmatpush.bf16.msra.mxu3 %v2180_v50  ;;  %v117_v12 = vrot.slane %v3090_v6, 4  ;;  %vm123_vm3 = vcmp.lt.s32.totalorder %v3094_v8, 4  ;;  %vm228_vm4 = vcmask 261120   ;;  %v2104_v24 = vor.u32 %v2639_v22, %v2103_v21  ;;  %v2655_v27 = vld [vmem:[%s4134_s1 + $0x84] sm:$0xf0]  ;;  %v2665_v22 = vld [vmem:[%s4136_s3 + $0x38] sm:$0xff] }
  0x1a   :  { %2831 = vrot.lane.b32.xlu1 %v2830_v16, %s3000_s0  ;;  %461 = vmatpush.bf16.msra.mxu2 %v2148_v30  ;;  %v130_v14 = vsel %vm123_vm3, %v115_v3, %v116_v11  ;;  %v2657_v16 = vld [vmem:[%s4134_s1 + $0x94] sm:$0xf0]  ;;  %v2108_v28 = vor.u32 %v2638_v23, %v2105_v25  ;;  %v118_v30 = vrot.slane %v3092_v7, 4  ;;  %v119_v31 = vrot.slane %v3096_v9, 4  ;;  %v2752_v8 = vld [vmem:[%s4140_s7 + $0xb0] sm:$0xff] }
  0x1b   :  { %v129_v17 = vsel %vm123_vm3, %v116_v11, %v117_v12  ;;  %v2176_v19 = vor.u32 %v2657_v16, %v2175_v15  ;;  %v120_v10 = vrot.slane %v3137_v32, 4  ;;  %v121_v38 = vrot.slane %v3139_v33, 4 }
  0x1c   :  { %404 = vmatpush.bf16.msra.mxu0 %v2136_v36  ;;  %v256_v20 = vpack.c.bf16 %v129_v17, %v130_v14  ;;  %v127_v34 = vsel %vm123_vm3, %v118_v30, %v119_v31  ;;  %v128_v35 = vsel %vm123_vm3, %v117_v12, %v118_v30  ;;  %vm237_vm5 = vcmask 523264   ;;  %v2664_v30 = vld [vmem:[%s4136_s3 + $0x30] sm:$0xff] }
  0x1d   :  { %495 = vmatpush.bf16.msra.mxu3 %v2172_v61  ;;  %436 = vmatpush.bf16.msra.mxu1 %v2176_v19  ;;  %v258_v36 = vpack.c.bf16 %v127_v34, %v128_v35  ;;  %vm246_vm6 = vcmask 785408   ;;  %vm686_vm7 = vcmask 1043456   ;;  %vm673_vm8 = vcmask 326656  }
  0x1e   :  { %2836 = vrot.lane.b32.xlu2 %v2835_v29, %s2999_s17  ;;  %462 = vmatpush.bf16.msra.mxu2 %v2140_v41  ;;  %v2168_v29 = vor.u32 %v2655_v27, %v2167_v26  ;;  %vm780_vm9 = vcmask 687104   ;;  %vm1249_vm10 = vcmask 1041408   ;;  %vm900_vm11 = vcmask 1014784  }
  0x1f   :  { %vm905_vm12 = vcmask 654336   ;;  %vm1242_vm13 = vcmask 293888   ;;  %vm1856_vm14 = vcmask 130048   ;;  %vm1643_vm15 = vcmask 916480  }
  0x20   :  { %405 = vmatpush.bf16.msra.mxu0 %v2128_v44  ;;  %2185 = vmatmul.msk.bf16.vlgmr.msra.gmra.mxu3 %vm228_vm4, %v256_v20 }
  0x21   :  { %2841 = vrot.lane.b32.xlu0 %v2840_v39, %s2998_s16  ;;  %437 = vmatpush.bf16.msra.mxu1 %v2168_v29  ;;  %v125_v39 = vsel %vm123_vm3, %v120_v10, %v121_v38 }
  0x22   :  { %2846 = vrot.lane.b32.xlu1 %v2845_v40, %s3000_s0  ;;  %463 = vmatpush.bf16.msra.mxu2 %v2132_v48  ;;  %v126_v40 = vsel %vm123_vm3, %v119_v31, %v120_v10 }
  0x23   :  { %v260_v43 = vpack.c.bf16 %v125_v39, %v126_v40 }
  0x24   :  { %406 = vmatpush.bf16.msra.mxu0 %v2120_v55  ;;  %2181 = vmatmul.msk.bf16.vlgmr.msra.gmra.mxu1 %vm228_vm4, %v256_v20 }
  0x25   :  { %690 = vmatpush.bf16.msrb.mxu1 %v2665_v22 }
  0x26   :  { %2851 = vrot.lane.b32.xlu2 %v2850_v47, %s2999_s17  ;;  %464 = vmatpush.bf16.msra.mxu2 %v2124_v57 }
  0x28   :  { %407 = vmatpush.bf16.msra.mxu0 %v2112_v1 }
  0x29   :  { %691 = vmatpush.bf16.msrb.mxu1 %v2664_v30 }
  0x2a   :  { %465 = vmatpush.bf16.msra.mxu2 %v2116_v2 }
  0x2c   :  { %408 = vmatpush.bf16.msra.mxu0 %v2104_v24 }
  0x2e   :  { %466 = vmatpush.bf16.msra.mxu2 %v2108_v28 }
  0x30   :  { %2186 = vmatmul.msk.bf16.gmra.mxu3 %vm228_vm4, %v258_v36 }
  0x34   :  { %2182 = vmatmul.msk.bf16.gmra.mxu1 %vm228_vm4, %v258_v36 }
  0x40   :  { %2187 = vmatmul.msk.bf16.gmra.mxu3 %vm228_vm4, %v260_v43 }
  0x44   :  { %2183 = vmatmul.msk.bf16.gmra.mxu1 %vm228_vm4, %v260_v43 }
  0x68   :  { %v2817_v13 = vpop.permute.xlu2 %2816 }
  0x69   :  { %v2819_v60 = vunpack.i.h.bf16 %v2817_v13  ;;  %v2818_v61 = vunpack.i.l.bf16 %v2817_v13 }
  0x70   :  { %v2822_v62 = vpop.permute.xlu2 %2821 }
  0x71   :  { %v2824_v11 = vunpack.i.h.bf16 %v2822_v62  ;;  %v2823_v12 = vunpack.i.l.bf16 %v2822_v62 }
  0x78   :  { %v2837_v26 = vpop.permute.xlu2 %2836 }
  0x79   :  { %v2839_v31 = vunpack.i.h.bf16 %v2837_v26  ;;  %v2838_v34 = vunpack.i.l.bf16 %v2837_v26 }
  0x7b   :  { %v2797_v37 = vpop.permute.xlu0 %2796 }
  0x7c   :  { %v2807_v18 = vpop.permute.xlu1 %2806  ;;  %v2799_v41 = vunpack.i.h.bf16 %v2797_v37  ;;  %v2798_v42 = vunpack.i.l.bf16 %v2797_v37 }
  0x7d   :  { %v2809_v44 = vunpack.i.h.bf16 %v2807_v18  ;;  %v2808_v45 = vunpack.i.l.bf16 %v2807_v18 }
  0x7e   :  { %v230_v49 = vsel %vm228_vm4, %v3088_v5, %v2799_v41  ;;  %v229_v50 = vsel %vm228_vm4, %v3086_v4, %v2798_v42  ;;  %v122_v5 = vrot.slane %v3170_v52, 4 }
  0x80   :  { %v124_v1 = vsel %vm123_vm3, %v121_v38, %v122_v5  ;;  %v131_v2 = vsel %vm123_vm3, %v122_v5, %v115_v3  ;;  %v609_v3 = vld [vmem:[%s4136_s3 + $0x50] sm:$0xf]  ;;  %v283_v5 = vld [vmem:[%s4135_s2] sm:$0x3] }
  0x81   :  { %v262_v16 = vpack.c.bf16 %v131_v2, %v124_v1  ;;  %v651_v23 = vunpack.c.l.b16 %v609_v3  ;;  %v3432_v62 = vperm.slane %v283_v5, 0  ;;  %v3435_v2 = vperm.slane %v283_v5, 1 }
  0x83   :  { %v2802_v46 = vpop.permute.xlu0 %2801  ;;  %2188 = vmatmul.msk.bf16.gmra.mxu3 %vm228_vm4, %v262_v16  ;;  %2184 = vmatmul.msk.bf16.gmra.mxu1 %vm228_vm4, %v262_v16  ;;  %v662_v29 = vpack.c.b16 %v651_v23, %v651_v23 }
  0x84   :  { %v2804_v47 = vunpack.i.h.bf16 %v2802_v46  ;;  %v2803_v48 = vunpack.i.l.bf16 %v2802_v46  ;;  %v2812_v57 = vpop.permute.xlu1 %2811 }
  0x85   :  { %v2814_v58 = vunpack.i.h.bf16 %v2812_v57  ;;  %v2813_v59 = vunpack.i.l.bf16 %v2812_v57  ;;  %v688_v35 = vsel %vm686_vm7, %v662_v29, 0  ;;  %v2659_v57 = vld [vmem:[%s4136_s3 + $0x8] sm:$0xff] }
  0x86   :  { %v238_v51 = vsel %vm237_vm5, %v229_v50, %v2803_v48  ;;  %v239_v53 = vsel %vm237_vm5, %v230_v49, %v2804_v47  ;;  %724 = vmatpush.bf16.msrb.mxu3 %v688_v35 }
  0x87   :  { %v247_v54 = vsel %vm246_vm6, %v238_v51, %v2808_v45  ;;  %v248_v55 = vsel %vm246_vm6, %v239_v53, %v2809_v44  ;;  %v232_v63 = vsel %vm228_vm4, %v3092_v7, %v2814_v58  ;;  %v231_v0 = vsel %vm228_vm4, %v3090_v6, %v2813_v59  ;;  %v2852_v45 = vpop.permute.xlu2 %2851  ;;  %v2658_v58 = vld [vmem:[%s4136_s3] sm:$0xff] }
  0x88   :  { %v255_v56 = vpack.c.bf16 %v248_v55, %v247_v54  ;;  %v240_v14 = vsel %vm237_vm5, %v231_v0, %v2818_v61  ;;  %v241_v15 = vsel %vm237_vm5, %v232_v63, %v2819_v60  ;;  %v2854_v48 = vunpack.i.h.bf16 %v2852_v45  ;;  %v2660_v55 = vld [vmem:[%s4136_s3 + $0x10] sm:$0xff]  ;;  %v2666_v59 = vld [vmem:[%s4136_s3 + $0x40] sm:$0xff] }
  0x89   :  { %v249_v7 = vsel %vm246_vm6, %v240_v14, %v2823_v12  ;;  %v250_v17 = vsel %vm246_vm6, %v241_v15, %v2824_v11  ;;  %v2853_v13 = vunpack.i.l.bf16 %v2852_v45 }
  0x8a   :  { %409 = vmatmul.bf16.vlgmr.msra.gmra.mxu0 %v255_v56  ;;  %467 = vmatmul.bf16.vlgmr.msra.gmra.mxu2 %v255_v56  ;;  %v257_v19 = vpack.c.bf16 %v250_v17, %v249_v7 }
  0x8b   :  { %v2827_v6 = vpop.permute.xlu0 %2826 }
  0x8c   :  { %v2829_v20 = vunpack.i.h.bf16 %v2827_v6  ;;  %v2828_v4 = vunpack.i.l.bf16 %v2827_v6  ;;  %v2832_v21 = vpop.permute.xlu1 %2831 }
  0x8d   :  { %v2834_v24 = vunpack.i.h.bf16 %v2832_v21  ;;  %v2833_v25 = vunpack.i.l.bf16 %v2832_v21 }
  0x8e   :  { %v234_v27 = vsel %vm228_vm4, %v3137_v32, %v2829_v20  ;;  %v233_v28 = vsel %vm228_vm4, %v3096_v9, %v2828_v4  ;;  %v2667_v32 = vld [vmem:[%s4136_s3 + $0x48] sm:$0xff] }
  0x8f   :  { %v242_v36 = vsel %vm237_vm5, %v233_v28, %v2833_v25  ;;  %v243_v37 = vsel %vm237_vm5, %v234_v27, %v2834_v24  ;;  %v2663_v9 = vld [vmem:[%s4136_s3 + $0x28] sm:$0xff]  ;;  %725 = vmatpush.bf16.msrb.mxu3 %v2667_v32 }
  0x90   :  { %v251_v10 = vsel %vm246_vm6, %v242_v36, %v2838_v34  ;;  %v252_v38 = vsel %vm246_vm6, %v243_v37, %v2839_v31  ;;  %692 = vmatpush.bf16.msrb.mxu1 %v2663_v9 }
  0x91   :  { %v259_v18 = vpack.c.bf16 %v252_v38, %v251_v10 }
  0x93   :  { %v2842_v39 = vpop.permute.xlu0 %2841  ;;  %726 = vmatpush.bf16.msrb.mxu3 %v2666_v59 }
  0x94   :  { %v2844_v40 = vunpack.i.h.bf16 %v2842_v39  ;;  %v2843_v41 = vunpack.i.l.bf16 %v2842_v39  ;;  %v2847_v42 = vpop.permute.xlu1 %2846 }
  0x95   :  { %v2849_v43 = vunpack.i.h.bf16 %v2847_v42  ;;  %v2848_v44 = vunpack.i.l.bf16 %v2847_v42 }
  0x96   :  { %v236_v46 = vsel %vm228_vm4, %v3170_v52, %v2844_v40  ;;  %v235_v47 = vsel %vm228_vm4, %v3139_v33, %v2843_v41  ;;  %v2662_v52 = vld [vmem:[%s4136_s3 + $0x20] sm:$0xff]  ;;  %v2661_v33 = vld [vmem:[%s4136_s3 + $0x18] sm:$0xff] }
  0x97   :  { %v244_v49 = vsel %vm237_vm5, %v235_v47, %v2848_v44  ;;  %v245_v50 = vsel %vm237_vm5, %v236_v46, %v2849_v43  ;;  %693 = vmatpush.bf16.msrb.mxu1 %v2662_v52 }
  0x98   :  { %v253_v51 = vsel %vm246_vm6, %v244_v49, %v2853_v13  ;;  %v254_v53 = vsel %vm246_vm6, %v245_v50, %v2854_v48 }
  0x99   :  { %v261_v54 = vpack.c.bf16 %v254_v53, %v253_v51 }
  0x9a   :  { %414 = vmatmul.bf16.gmra.mxu0 %v257_v19  ;;  %472 = vmatmul.bf16.gmra.mxu2 %v257_v19 }
  0x9b   :  { %694 = vmatpush.bf16.msrb.mxu1 %v2661_v33 }
  0x9f   :  { %695 = vmatpush.bf16.msrb.mxu1 %v2660_v55 }
  0xa1   :  { %v439_v56 = vpop.f32.mrf.mxu1 }
  0xa3   :  { %696 = vmatpush.bf16.msrb.mxu1 %v2659_v57  ;;  %v497_v60 = vpop.f32.mrf.mxu3 }
  0xa7   :  { %697 = vmatpush.bf16.msrb.mxu1 %v2658_v58 }
  0xa9   :  { %v441_v61 = vpop.f32.mrf.mxu1 }
  0xaa   :  { %419 = vmatmul.bf16.gmra.mxu0 %v259_v18  ;;  %477 = vmatmul.bf16.gmra.mxu2 %v259_v18 }
  0xab   :  { %v499_v11 = vpop.f32.mrf.mxu3 }
  0xb1   :  { %v444_v14 = vpop.f32.mrf.mxu1 }
  0xb3   :  { %v502_v3 = vpop.f32.mrf.mxu3 }
  0xb9   :  { %v446_v24 = vpop.f32.mrf.mxu1 }
  0xba   :  { %424 = vmatmul.bf16.gmra.mxu0 %v261_v54  ;;  %482 = vmatmul.bf16.gmra.mxu2 %v261_v54 }
  0xbb   :  { %v504_v18 = vpop.f32.mrf.mxu3 }
  0xc1   :  { %v449_v43 = vpop.f32.mrf.mxu1 }
  0xc9   :  { %v451_v5 = vpop.f32.mrf.mxu1 }
 0x107   :  { %v410_v63 = vpop.f32.mrf.mxu0 }
 0x108   :  { %v411_v0 = vadd.f32 %v410_v63, %v3432_v62 }
 0x10a   :  { %v440_v1 = vadd.f32 %v439_v56, %v411_v0  ;;  %v507_v56 = vpop.f32.mrf.mxu3 }
 0x10c   :  { %v517_v15 = vmul.f32 0.5, %v440_v1 }
 0x10d   :  { %v468_v12 = vpop.f32.mrf.mxu2 }
 0x10e   :  { %v469_v16 = vadd.f32 %v468_v12, %v3435_v2  ;;  %2918 = vtanh.f32 %v517_v15 }
 0x10f   :  { %v412_v7 = vpop.f32.mrf.mxu0 }
 0x110   :  { %v498_v17 = vadd.f32 %v497_v60, %v469_v16  ;;  %v413_v6 = vadd.f32 %v412_v7, %v3432_v62 }
 0x112   :  { %v442_v19 = vadd.f32 %v441_v61, %v413_v6  ;;  %v518_v20 = vmul.f32 0.5, %v498_v17 }
 0x114   :  { %v519_v4 = vmul.f32 0.5, %v442_v19  ;;  %v2919_v25 = vpop.eup %2918 }
 0x115   :  { %v470_v21 = vpop.f32.mrf.mxu2  ;;  %v549_v30 = vmul.f32 0.5, %v2919_v25 }
 0x116   :  { %2920 = vtanh.f32 %v519_v4  ;;  %v471_v22 = vadd.f32 %v470_v21, %v3435_v2  ;;  %v509_v21 = vpop.f32.mrf.mxu3 }
 0x117   :  { %v415_v23 = vpop.f32.mrf.mxu0  ;;  %2922 = vtanh.f32 %v518_v20  ;;  %v565_v9 = vadd.f32 0.5, %v549_v30 }
 0x118   :  { %v500_v26 = vadd.f32 %v499_v11, %v471_v22  ;;  %v416_v27 = vadd.f32 %v415_v23, %v3432_v62 }
 0x11a   :  { %v520_v28 = vmul.f32 0.5, %v500_v26  ;;  %v445_v29 = vadd.f32 %v444_v14, %v416_v27  ;;  %v454_v26 = vpop.f32.mrf.mxu1 }
 0x11c   :  { %v2921_v31 = vpop.eup %2920  ;;  %2924 = vtanh.f32 %v520_v28  ;;  %v521_v37 = vmul.f32 0.5, %v445_v29 }
 0x11d   :  { %v551_v34 = vmul.f32 0.5, %v2921_v31  ;;  %v473_v35 = vpop.f32.mrf.mxu2  ;;  %v2923_v36 = vpop.eup %2922 }
 0x11e   :  { %v474_v32 = vadd.f32 %v473_v35, %v3435_v2  ;;  %v550_v41 = vmul.f32 0.5, %v2923_v36  ;;  %2926 = vtanh.f32 %v521_v37 }
 0x11f   :  { %v567_v10 = vadd.f32 0.5, %v551_v34  ;;  %v417_v38 = vpop.f32.mrf.mxu0 }
 0x120   :  { %v503_v39 = vadd.f32 %v502_v3, %v474_v32  ;;  %v418_v40 = vadd.f32 %v417_v38, %v3432_v62  ;;  %v566_v13 = vadd.f32 0.5, %v550_v41 }
 0x121   :  { %v581_v42 = vpack.c.bf16 %v567_v10, %v565_v9  ;;  %v512_v10 = vpop.f32.mrf.mxu3 }
 0x122   :  { %v2925_v44 = vpop.eup %2924  ;;  %v447_v45 = vadd.f32 %v446_v24, %v418_v40  ;;  %v522_v47 = vmul.f32 0.5, %v503_v39 }
 0x123   :  { %v552_v46 = vmul.f32 0.5, %v2925_v44  ;;  %698 = vmatmul.bf16.vlgmr.msrb.gmra.mxu1 %v581_v42  ;;  %v456_v42 = vpop.f32.mrf.mxu1 }
 0x124   :  { %v523_v48 = vmul.f32 0.5, %v447_v45  ;;  %v2927_v52 = vpop.eup %2926 }
 0x125   :  { %v568_v49 = vadd.f32 0.5, %v552_v46  ;;  %v475_v50 = vpop.f32.mrf.mxu2  ;;  %v553_v59 = vmul.f32 0.5, %v2927_v52 }
 0x126   :  { %2928 = vtanh.f32 %v523_v48  ;;  %v476_v51 = vadd.f32 %v475_v50, %v3435_v2 }
 0x127   :  { %v420_v53 = vpop.f32.mrf.mxu0  ;;  %v582_v54 = vpack.c.bf16 %v568_v49, %v566_v13  ;;  %2930 = vtanh.f32 %v522_v47  ;;  %v569_v14 = vadd.f32 0.5, %v553_v59 }
 0x128   :  { %v505_v33 = vadd.f32 %v504_v18, %v476_v51  ;;  %v421_v55 = vadd.f32 %v420_v53, %v3432_v62 }
 0x129   :  { %2229 = vmatmul.msk.bf16.vlgmr.msrb.gmra.mxu3 %vm673_vm8, %v582_v54 }
 0x12a   :  { %v524_v57 = vmul.f32 0.5, %v505_v33  ;;  %v450_v58 = vadd.f32 %v449_v43, %v421_v55 }
 0x12c   :  { %v2929_v60 = vpop.eup %2928  ;;  %2932 = vtanh.f32 %v524_v57  ;;  %v525_v1 = vmul.f32 0.5, %v450_v58 }
 0x12d   :  { %v555_v61 = vmul.f32 0.5, %v2929_v60  ;;  %v478_v63 = vpop.f32.mrf.mxu2  ;;  %v2931_v0 = vpop.eup %2930 }
 0x12e   :  { %v479_v11 = vadd.f32 %v478_v63, %v3435_v2  ;;  %v554_v17 = vmul.f32 0.5, %v2931_v0  ;;  %2934 = vtanh.f32 %v525_v1 }
 0x12f   :  { %v422_v12 = vpop.f32.mrf.mxu0  ;;  %v571_v15 = vadd.f32 0.5, %v555_v61 }
 0x130   :  { %v508_v16 = vadd.f32 %v507_v56, %v479_v11  ;;  %v423_v7 = vadd.f32 %v422_v12, %v3432_v62  ;;  %v570_v23 = vadd.f32 0.5, %v554_v17  ;;  %v514_v56 = vpop.f32.mrf.mxu3 }
 0x131   :  { %v583_v6 = vpack.c.bf16 %v571_v15, %v569_v14 }
 0x132   :  { %v2933_v19 = vpop.eup %2932  ;;  %v452_v20 = vadd.f32 %v451_v5, %v423_v7  ;;  %v526_v3 = vmul.f32 0.5, %v508_v16 }
 0x133   :  { %v556_v4 = vmul.f32 0.5, %v2933_v19  ;;  %703 = vmatmul.bf16.gmra.mxu1 %v583_v6 }
 0x134   :  { %v527_v22 = vmul.f32 0.5, %v452_v20  ;;  %v2935_v30 = vpop.eup %2934 }
 0x135   :  { %v572_v24 = vadd.f32 0.5, %v556_v4  ;;  %v480_v25 = vpop.f32.mrf.mxu2  ;;  %v557_v37 = vmul.f32 0.5, %v2935_v30 }
 0x136   :  { %2936 = vtanh.f32 %v527_v22  ;;  %v481_v27 = vadd.f32 %v480_v25, %v3435_v2 }
 0x137   :  { %v425_v28 = vpop.f32.mrf.mxu0  ;;  %v584_v29 = vpack.c.bf16 %v572_v24, %v570_v23  ;;  %2938 = vtanh.f32 %v526_v3  ;;  %v573_v43 = vadd.f32 0.5, %v557_v37 }
 0x138   :  { %v510_v31 = vadd.f32 %v509_v21, %v481_v27  ;;  %v426_v34 = vadd.f32 %v425_v28, %v3432_v62 }
 0x139   :  { %2230 = vmatmul.msk.bf16.gmra.mxu3 %vm673_vm8, %v584_v29 }
 0x13a   :  { %v528_v35 = vmul.f32 0.5, %v510_v31  ;;  %v455_v36 = vadd.f32 %v454_v26, %v426_v34 }
 0x13c   :  { %v2937_v32 = vpop.eup %2936  ;;  %2940 = vtanh.f32 %v528_v35  ;;  %v529_v39 = vmul.f32 0.5, %v455_v36 }
 0x13d   :  { %v559_v9 = vmul.f32 0.5, %v2937_v32  ;;  %v483_v38 = vpop.f32.mrf.mxu2  ;;  %v2939_v18 = vpop.eup %2938 }
 0x13e   :  { %v484_v40 = vadd.f32 %v483_v38, %v3435_v2  ;;  %v558_v47 = vmul.f32 0.5, %v2939_v18  ;;  %2942 = vtanh.f32 %v529_v39 }
 0x13f   :  { %v427_v41 = vpop.f32.mrf.mxu0  ;;  %v575_v44 = vadd.f32 0.5, %v559_v9 }
 0x140   :  { %v513_v45 = vadd.f32 %v512_v10, %v484_v40  ;;  %v428_v46 = vadd.f32 %v427_v41, %v3432_v62  ;;  %v574_v54 = vadd.f32 0.5, %v558_v47 }
 0x141   :  { %v585_v48 = vpack.c.bf16 %v575_v44, %v573_v43 }
 0x142   :  { %v2941_v13 = vpop.eup %2940  ;;  %v457_v49 = vadd.f32 %v456_v42, %v428_v46  ;;  %v530_v51 = vmul.f32 0.5, %v513_v45 }
 0x143   :  { %v560_v50 = vmul.f32 0.5, %v2941_v13  ;;  %708 = vmatmul.bf16.gmra.mxu1 %v585_v48 }
 0x144   :  { %v531_v53 = vmul.f32 0.5, %v457_v49  ;;  %v2943_v58 = vpop.eup %2942 }
 0x145   :  { %v576_v52 = vadd.f32 0.5, %v560_v50  ;;  %v485_v33 = vpop.f32.mrf.mxu2  ;;  %v561_v5 = vmul.f32 0.5, %v2943_v58 }
 0x146   :  { %2944 = vtanh.f32 %v531_v53  ;;  %v486_v55 = vadd.f32 %v485_v33, %v3435_v2 }
 0x147   :  { %v586_v57 = vpack.c.bf16 %v576_v52, %v574_v54  ;;  %2946 = vtanh.f32 %v530_v51  ;;  %v577_v0 = vadd.f32 0.5, %v561_v5 }
 0x148   :  { %v515_v62 = vadd.f32 %v514_v56, %v486_v55 }
 0x149   :  { %2231 = vmatmul.msk.bf16.gmra.mxu3 %vm673_vm8, %v586_v57 }
 0x14a   :  { %v532_v59 = vmul.f32 0.5, %v515_v62 }
 0x14c   :  { %v2945_v60 = vpop.eup %2944  ;;  %2948 = vtanh.f32 %v532_v59 }
 0x14d   :  { %v563_v61 = vmul.f32 0.5, %v2945_v60  ;;  %v2947_v63 = vpop.eup %2946  ;;  %v2355_v60 = vld [vmem:[%s4137_s4 + $0xf0] sm:$0xf] }
 0x14e   :  { %v562_v11 = vmul.f32 0.5, %v2947_v63  ;;  %v2291_v63 = vld [vmem:[%s4137_s4 + $0x70] sm:$0xf] }
 0x14f   :  { %v579_v1 = vadd.f32 0.5, %v563_v61  ;;  %v2699_v61 = vld [vmem:[%s4137_s4 + $0xf4] sm:$0xf0] }
 0x150   :  { %v578_v2 = vadd.f32 0.5, %v562_v11  ;;  %v2347_v11 = vld [vmem:[%s4137_s4 + $0xe0] sm:$0xf] }
 0x151   :  { %v587_v12 = vpack.c.bf16 %v579_v1, %v577_v0  ;;  %v2356_v0 = vor.u32 %v2699_v61, %v2355_v60  ;;  %v2683_v1 = vld [vmem:[%s4137_s4 + $0x74] sm:$0xf0] }
 0x152   :  { %v2949_v14 = vpop.eup %2948 }
 0x153   :  { %v564_v15 = vmul.f32 0.5, %v2949_v14  ;;  %713 = vmatmul.bf16.gmra.mxu1 %v587_v12  ;;  %v2292_v14 = vor.u32 %v2683_v1, %v2291_v63  ;;  %1275 = vmatpush.bf16.msrb.mxu2 %v2356_v0 }
 0x155   :  { %v580_v16 = vadd.f32 0.5, %v564_v15  ;;  %v2697_v15 = vld [vmem:[%s4137_s4 + $0xe4] sm:$0xf0]  ;;  %1256 = vmatpush.bf16.msrb.mxu0 %v2292_v14 }
 0x157   :  { %v588_v7 = vpack.c.bf16 %v580_v16, %v578_v2  ;;  %v2283_v2 = vld [vmem:[%s4137_s4 + $0x60] sm:$0xf] }
 0x159   :  { %2232 = vmatmul.msk.bf16.gmra.mxu3 %vm673_vm8, %v588_v7 }
 0x1a0   :  { %v699_v17 = vpop.f32.mrf.mxu1 }
 0x1a8   :  { %v701_v6 = vpop.f32.mrf.mxu1 }
 0x1ac   :  { %v728_v19 = vpop.f32.mrf.mxu3 }
 0x1ad   :  { %v3456_v4 = vadd.f32 %v728_v19, %v699_v17  ;;  %v2681_v19 = vld [vmem:[%s4137_s4 + $0x64] sm:$0xf0] }
 0x1af   :  { %v748_v22 = vrot.slane %v3456_v4, 1 }
 0x1b0   :  { %v704_v20 = vpop.f32.mrf.mxu1 }
 0x1b4   :  { %v730_v21 = vpop.f32.mrf.mxu3 }
 0x1b5   :  { %v731_v3 = vadd.f32 %v730_v21, %v701_v6  ;;  %v2348_v6 = vor.u32 %v2697_v15, %v2347_v11 }
 0x1b7   :  { %v749_v23 = vrot.slane %v731_v3, 1  ;;  %1276 = vmatpush.bf16.msrb.mxu2 %v2348_v6 }
 0x1b8   :  { %v706_v27 = vpop.f32.mrf.mxu1 }
 0x1b9   :  { %v762_v24 = vsel %vm72_vm0, %v748_v22, %v749_v23 }
 0x1ba   :  { %v764_v25 = vadd.f32 %v762_v24, %v3456_v4  ;;  %v2339_v24 = vld [vmem:[%s4137_s4 + $0xd0] sm:$0xf] }
 0x1bc   :  { %v772_v26 = vmul.f32 0.5, %v764_v25  ;;  %v733_v28 = vpop.f32.mrf.mxu3  ;;  %v2695_v25 = vld [vmem:[%s4137_s4 + $0xd4] sm:$0xf0] }
 0x1bd   :  { %v734_v29 = vadd.f32 %v733_v28, %v704_v20 }
 0x1be   :  { %781 = vst.msk [vmem:[#allocation2] sm:$0xff] %vm780_vm9, %v772_v26 }
 0x1bf   :  { %v750_v30 = vrot.slane %v734_v29, 1 }
 0x1c0   :  { %v709_v32 = vpop.f32.mrf.mxu1 }
 0x1c1   :  { %v761_v31 = vsel %vm72_vm0, %v749_v23, %v750_v30  ;;  %v2284_v23 = vor.u32 %v2681_v19, %v2283_v2 }
 0x1c2   :  { %v765_v34 = vadd.f32 %v761_v31, %v731_v3  ;;  %v2693_v31 = vld [vmem:[%s4137_s4 + $0xc4] sm:$0xf0] }
 0x1c3   :  { %1257 = vmatpush.bf16.msrb.mxu0 %v2284_v23 }
 0x1c4   :  { %v773_v35 = vmul.f32 0.5, %v765_v34  ;;  %v735_v36 = vpop.f32.mrf.mxu3  ;;  %v2682_v34 = vld [vmem:[%s4137_s4 + $0x74] sm:$0xf] }
 0x1c5   :  { %v736_v37 = vadd.f32 %v735_v36, %v706_v27 }
 0x1c6   :  { %782 = vst.msk [vmem:[#allocation2 + $0x8] sm:$0xff] %vm780_vm9, %v773_v35 }
 0x1c7   :  { %v751_v9 = vrot.slane %v736_v37, 1 }
 0x1c8   :  { %v711_v42 = vpop.f32.mrf.mxu1 }
 0x1c9   :  { %v760_v10 = vsel %vm72_vm0, %v750_v30, %v751_v9  ;;  %v2331_v30 = vld [vmem:[%s4137_s4 + $0xc0] sm:$0xf] }
 0x1ca   :  { %v766_v38 = vadd.f32 %v760_v10, %v734_v29  ;;  %v2679_v29 = vld [vmem:[%s4137_s4 + $0x54] sm:$0xf0] }
 0x1cc   :  { %v774_v18 = vmul.f32 0.5, %v766_v38  ;;  %v738_v39 = vpop.f32.mrf.mxu3 }
 0x1cd   :  { %v739_v40 = vadd.f32 %v738_v39, %v709_v32  ;;  %v3479_v62 = vld [vmem:[#allocation2] ss:$2 sm:$0xff]  ;;  %v2293_v32 = vld [vmem:[%s4137_s4 + $0x78] sm:$0xf0] }
 0x1ce   :  { %783 = vst.msk [vmem:[#allocation2 + $0x10] sm:$0xff] %vm780_vm9, %v774_v18  ;;  %v812_v16 = vrot.slane %v3479_v62, 3  ;;  %v804_v7 = vrot.slane %v3479_v62, 2  ;;  %v796_v17 = vrot.slane %v3479_v62, 1  ;;  %v2267_v18 = vld [vmem:[%s4137_s4 + $0x40] sm:$0xf]  ;;  %v2296_v39 = vor.u32 %v2682_v34, %v2293_v32 }
 0x1cf   :  { %v752_v41 = vrot.slane %v739_v40, 1 }
 0x1d0   :  { %v714_v49 = vpop.f32.mrf.mxu1  ;;  %1332 = vmatpush.bf16.msra.mxu1 %v2296_v39 }
 0x1d1   :  { %v759_v43 = vsel %vm72_vm0, %v751_v9, %v752_v41  ;;  %v2698_v9 = vld [vmem:[%s4137_s4 + $0xf4] sm:$0xf] }
 0x1d2   :  { %v767_v44 = vadd.f32 %v759_v43, %v736_v37  ;;  %v2340_v37 = vor.u32 %v2695_v25, %v2339_v24 }
 0x1d4   :  { %v775_v45 = vmul.f32 0.5, %v767_v44  ;;  %v740_v46 = vpop.f32.mrf.mxu3  ;;  %1277 = vmatpush.bf16.msrb.mxu2 %v2340_v37  ;;  %v2678_v37 = vld [vmem:[%s4137_s4 + $0x54] sm:$0xf] }
 0x1d5   :  { %v741_v47 = vadd.f32 %v740_v46, %v711_v42 }
 0x1d6   :  { %784 = vst.msk [vmem:[#allocation2 + $0x18] sm:$0xff] %vm780_vm9, %v775_v45  ;;  %v2677_v45 = vld [vmem:[%s4137_s4 + $0x44] sm:$0xf0] }
 0x1d7   :  { %v753_v48 = vrot.slane %v741_v47, 1 }
 0x1d8   :  { %v716_v56 = vpop.f32.mrf.mxu1 }
 0x1d9   :  { %v758_v13 = vsel %vm72_vm0, %v752_v41, %v753_v48 }
 0x1da   :  { %v768_v50 = vadd.f32 %v758_v13, %v739_v40  ;;  %v2357_v40 = vld [vmem:[%s4137_s4 + $0xf8] sm:$0xf0] }
 0x1dc   :  { %v776_v51 = vmul.f32 0.5, %v768_v50  ;;  %v743_v53 = vpop.f32.mrf.mxu3 }
 0x1dd   :  { %v744_v54 = vadd.f32 %v743_v53, %v714_v49  ;;  %v3481_v59 = vld [vmem:[#allocation2 + $0x10] ss:$2 sm:$0xff] }
 0x1de   :  { %785 = vst.msk [vmem:[#allocation2 + $0x20] sm:$0xff] %vm780_vm9, %v776_v51  ;;  %v813_v3 = vrot.slane %v3481_v59, 3  ;;  %v805_v28 = vrot.slane %v3481_v59, 2  ;;  %v797_v4 = vrot.slane %v3481_v59, 1  ;;  %v2332_v51 = vor.u32 %v2693_v31, %v2331_v30  ;;  %v2349_v30 = vld [vmem:[%s4137_s4 + $0xe8] sm:$0xf0] }
 0x1df   :  { %v754_v52 = vrot.slane %v744_v54, 1 }
 0x1e0   :  { %v818_v42 = vsel %vm106_vm1, %v812_v16, %v813_v3  ;;  %v810_v46 = vsel %vm89_vm2, %v804_v7, %v805_v28  ;;  %1278 = vmatpush.bf16.msrb.mxu2 %v2332_v51  ;;  %v2674_v51 = vld [vmem:[%s4137_s4 + $0x34] sm:$0xf] }
 0x1e1   :  { %v757_v33 = vsel %vm72_vm0, %v753_v48, %v754_v52  ;;  %v2360_v48 = vor.u32 %v2698_v9, %v2357_v40  ;;  %v2277_v9 = vld [vmem:[%s4137_s4 + $0x58] sm:$0xf0] }
 0x1e2   :  { %v769_v55 = vadd.f32 %v757_v33, %v741_v47  ;;  %v802_v47 = vsel %vm72_vm0, %v796_v17, %v797_v4  ;;  %v2268_v33 = vor.u32 %v2677_v45, %v2267_v18  ;;  %v2341_v18 = vld [vmem:[%s4137_s4 + $0xd8] sm:$0xf0]  ;;  %v2280_v39 = vor.u32 %v2678_v37, %v2277_v9  ;;  %v2269_v45 = vld [vmem:[%s4137_s4 + $0x48] sm:$0xf0]  ;;  %v2713_v37 = vld [vmem:[%s4137_s4 + $0x164] sm:$0xf0] }
 0x1e3   :  { %1351 = vmatpush.bf16.msra.mxu3 %v2360_v48 }
 0x1e4   :  { %v777_v57 = vmul.f32 0.5, %v769_v55  ;;  %v745_v58 = vpop.f32.mrf.mxu3  ;;  %v2323_v55 = vld [vmem:[%s4137_s4 + $0xb0] sm:$0xf] }
 0x1e5   :  { %v746_v5 = vadd.f32 %v745_v58, %v716_v56  ;;  %v2691_v56 = vld [vmem:[%s4137_s4 + $0xb4] sm:$0xf0] }
 0x1e6   :  { %786 = vst.msk [vmem:[#allocation2 + $0x28] sm:$0xff] %vm780_vm9, %v777_v57  ;;  %v2324_v57 = vor.u32 %v2691_v56, %v2323_v55 }
 0x1e7   :  { %v755_v12 = vrot.slane %v746_v5, 1 }
 0x1e8   :  { %1279 = vmatpush.bf16.msrb.mxu2 %v2324_v57  ;;  %v2243_v57 = vld [vmem:[%s4137_s4 + $0x10] sm:$0xf] }
 0x1e9   :  { %v756_v20 = vsel %vm72_vm0, %v754_v52, %v755_v12  ;;  %v763_v21 = vsel %vm72_vm0, %v755_v12, %v748_v22  ;;  %v2275_v22 = vld [vmem:[%s4137_s4 + $0x50] sm:$0xf] }
 0x1ea   :  { %v770_v26 = vadd.f32 %v756_v20, %v744_v54  ;;  %v771_v27 = vadd.f32 %v763_v21, %v746_v5  ;;  %v2276_v38 = vor.u32 %v2679_v29, %v2275_v22  ;;  %v821_v20 = vrot.slane %v3481_v59, 4  ;;  %v2285_v22 = vld [vmem:[%s4137_s4 + $0x68] sm:$0xf0]  ;;  %v2696_v29 = vld [vmem:[%s4137_s4 + $0xe4] sm:$0xf] }
 0x1eb   :  { %v2352_v34 = vor.u32 %v2696_v29, %v2349_v30  ;;  %v2715_v29 = vld [vmem:[%s4137_s4 + $0x174] sm:$0xf0] }
 0x1ec   :  { %v778_v35 = vmul.f32 0.5, %v770_v26  ;;  %v779_v36 = vmul.f32 0.5, %v771_v27  ;;  %1258 = vmatpush.bf16.msrb.mxu0 %v2276_v38  ;;  %v2259_v26 = vld [vmem:[%s4137_s4 + $0x30] sm:$0xf]  ;;  %v2675_v27 = vld [vmem:[%s4137_s4 + $0x34] sm:$0xf0] }
 0x1ed   :  { %v3547_v10 = vld [vmem:[#allocation2 + $0x20] ss:$2 sm:$0xff]  ;;  %v2694_v38 = vld [vmem:[%s4137_s4 + $0xd4] sm:$0xf]  ;;  %1352 = vmatpush.bf16.msra.mxu3 %v2352_v34 }
 0x1ee   :  { %787 = vst.msk [vmem:[#allocation2 + $0x30] sm:$0xff] %vm780_vm9, %v778_v35  ;;  %v814_v41 = vrot.slane %v3547_v10, 3  ;;  %v806_v43 = vrot.slane %v3547_v10, 2  ;;  %v798_v44 = vrot.slane %v3547_v10, 1  ;;  %v822_v19 = vrot.slane %v3547_v10, 4 }
 0x1ef   :  { %788 = vst.msk [vmem:[#allocation2 + $0x38] sm:$0xff] %vm780_vm9, %v779_v36  ;;  %v2315_v35 = vld [vmem:[%s4137_s4 + $0xa0] sm:$0xf]  ;;  %v2689_v36 = vld [vmem:[%s4137_s4 + $0xa4] sm:$0xf0]  ;;  %v2344_v40 = vor.u32 %v2694_v38, %v2341_v18 }
 0x1f0   :  { %v817_v13 = vsel %vm106_vm1, %v813_v3, %v814_v41  ;;  %v809_v49 = vsel %vm89_vm2, %v805_v28, %v806_v43  ;;  %v801_v50 = vsel %vm72_vm0, %v797_v4, %v798_v44  ;;  %1259 = vmatpush.bf16.msrb.mxu0 %v2268_v33  ;;  %v2680_v28 = vld [vmem:[%s4137_s4 + $0x64] sm:$0xf]  ;;  %v2260_v4 = vor.u32 %v2675_v27, %v2259_v26  ;;  %v2325_v33 = vld [vmem:[%s4137_s4 + $0xb8] sm:$0xf0]  ;;  %v2301_v27 = vld [vmem:[%s4137_s4 + $0x88] sm:$0xf0] }
 0x1f1   :  { %v2865_v53 = vpack.i.bf16 %v817_v13, %v818_v42  ;;  %v2860_v54 = vpack.i.bf16 %v809_v49, %v810_v46  ;;  %v2855_v52 = vpack.i.bf16 %v801_v50, %v802_v47  ;;  %v2288_v31 = vor.u32 %v2680_v28, %v2285_v22  ;;  %1353 = vmatpush.bf16.msra.mxu3 %v2344_v40  ;;  %v2673_v42 = vld [vmem:[%s4137_s4 + $0x24] sm:$0xf0]  ;;  %v2692_v46 = vld [vmem:[%s4137_s4 + $0xc4] sm:$0xf]  ;;  %v2333_v47 = vld [vmem:[%s4137_s4 + $0xc8] sm:$0xf0] }
 0x1f2   :  { %v2316_v32 = vor.u32 %v2689_v36, %v2315_v35  ;;  %v2336_v13 = vor.u32 %v2692_v46, %v2333_v47  ;;  %v2307_v49 = vld [vmem:[%s4137_s4 + $0x90] sm:$0xf]  ;;  %v2687_v50 = vld [vmem:[%s4137_s4 + $0x94] sm:$0xf0]  ;;  %v2684_v26 = vld [vmem:[%s4137_s4 + $0x84] sm:$0xf] }
 0x1f3   :  { %2866 = vrot.lane.b32.xlu2 %v2865_v53, %s3001_s30  ;;  %2861 = vrot.lane.b32.xlu1 %v2860_v54, %s3002_s14  ;;  %v2308_v53 = vor.u32 %v2687_v50, %v2307_v49  ;;  %v2261_v54 = vld [vmem:[%s4137_s4 + $0x38] sm:$0xf0]  ;;  %v2419_v22 = vld [vmem:[%s4137_s4 + $0x170] sm:$0xf] }
 0x1f4   :  { %2856 = vrot.lane.b32.xlu0 %v2855_v52, %s3003_s15  ;;  %1260 = vmatpush.bf16.msrb.mxu0 %v2260_v4  ;;  %v2690_v52 = vld [vmem:[%s4137_s4 + $0xb4] sm:$0xf]  ;;  %v2264_v55 = vor.u32 %v2674_v51, %v2261_v54  ;;  %v2304_v4 = vor.u32 %v2684_v26, %v2301_v27  ;;  %v2420_v30 = vor.u32 %v2715_v29, %v2419_v22  ;;  %v2411_v36 = vld [vmem:[%s4137_s4 + $0x160] sm:$0xf]  ;;  %v2711_v38 = vld [vmem:[%s4137_s4 + $0x154] sm:$0xf0] }
 0x1f5   :  { %1333 = vmatpush.bf16.msra.mxu1 %v2288_v31  ;;  %1280 = vmatpush.bf16.msrb.mxu2 %v2316_v32  ;;  %v2328_v56 = vor.u32 %v2690_v52, %v2325_v33  ;;  %v3759_v31 = vld [vmem:[%s4137_s4 + $0x1a0] sm:$0x33]  ;;  %v2403_v32 = vld [vmem:[%s4137_s4 + $0x150] sm:$0xf]  ;;  %v2412_v9 = vor.u32 %v2713_v37, %v2411_v36  ;;  %v2707_v47 = vld [vmem:[%s4137_s4 + $0x134] sm:$0xf0] }
 0x1f6   :  { %v3587_v58 = vld [vmem:[#allocation2 + $0x30] ss:$2 sm:$0xff]  ;;  %1354 = vmatpush.bf16.msra.mxu3 %v2336_v13  ;;  %v1134_v34 = vunpack.c.l.b16 %v3759_v31  ;;  %v2395_v40 = vld [vmem:[%s4137_s4 + $0x140] sm:$0xf]  ;;  %v2705_v49 = vld [vmem:[%s4137_s4 + $0x124] sm:$0xf0] }
 0x1f7   :  { %v815_v5 = vrot.slane %v3587_v58, 3  ;;  %v807_v60 = vrot.slane %v3587_v58, 2  ;;  %v799_v61 = vrot.slane %v3587_v58, 1  ;;  %v2387_v46 = vld [vmem:[%s4137_s4 + $0x130] sm:$0xf] }
 0x1f8   :  { %v1188_v35 = vpack.c.b16 %v1134_v34, %v1134_v34  ;;  %v2379_v13 = vld [vmem:[%s4137_s4 + $0x120] sm:$0xf]  ;;  %v2717_v51 = vld [vmem:[%s4137_s4 + $0x184] sm:$0xf0]  ;;  %v2371_v52 = vld [vmem:[%s4137_s4 + $0x110] sm:$0xf] }
 0x1f9   :  { %v816_v63 = vsel %vm106_vm1, %v814_v41, %v815_v5  ;;  %v819_v0 = vsel %vm106_vm1, %v815_v5, %v812_v16  ;;  %v808_v1 = vsel %vm89_vm2, %v806_v43, %v807_v60  ;;  %v811_v11 = vsel %vm89_vm2, %v807_v60, %v804_v7  ;;  %1334 = vmatpush.bf16.msra.mxu1 %v2280_v39  ;;  %v2251_v41 = vld [vmem:[%s4137_s4 + $0x20] sm:$0xf]  ;;  %v2676_v43 = vld [vmem:[%s4137_s4 + $0x44] sm:$0xf]  ;;  %v2671_v5 = vld [vmem:[%s4137_s4 + $0x14] sm:$0xf0] }
 0x1fa   :  { %v2880_v12 = vpack.i.bf16 %v819_v0, %v816_v63  ;;  %v2875_v14 = vpack.i.bf16 %v811_v11, %v808_v1  ;;  %v800_v15 = vsel %vm72_vm0, %v798_v44, %v799_v61  ;;  %v803_v2 = vsel %vm72_vm0, %v799_v61, %v796_v17  ;;  %v2672_v60 = vld [vmem:[%s4137_s4 + $0x24] sm:$0xf]  ;;  %1281 = vmatpush.bf16.msrb.mxu2 %v2308_v53  ;;  %v2253_v63 = vld [vmem:[%s4137_s4 + $0x28] sm:$0xf0]  ;;  %v2299_v11 = vld [vmem:[%s4137_s4 + $0x80] sm:$0xf] }
 0x1fb   :  { %v2870_v6 = vpack.i.bf16 %v803_v2, %v800_v15  ;;  %v823_v16 = vrot.slane %v3587_v58, 4  ;;  %v820_v7 = vrot.slane %v3479_v62, 4  ;;  %v825_v17 = vsel %vm123_vm3, %v821_v20, %v822_v19  ;;  %v2688_v0 = vld [vmem:[%s4137_s4 + $0xa4] sm:$0xf]  ;;  %v2317_v1 = vld [vmem:[%s4137_s4 + $0xa8] sm:$0xf0]  ;;  %1355 = vmatpush.bf16.msra.mxu3 %v2328_v56 }
 0x1fc   :  { %2881 = vrot.lane.b32.xlu2 %v2880_v12, %s3001_s30  ;;  %2876 = vrot.lane.b32.xlu1 %v2875_v14, %s3002_s14  ;;  %v2252_v44 = vor.u32 %v2673_v42, %v2251_v41  ;;  %v2272_v48 = vor.u32 %v2676_v43, %v2269_v45  ;;  %v2244_v61 = vor.u32 %v2671_v5, %v2243_v57  ;;  %v2685_v12 = vld [vmem:[%s4137_s4 + $0x84] sm:$0xf0]  ;;  %v1251_v18 = vsel %vm1249_vm10, %v1188_v35, 0  ;;  %v2435_v43 = vld [vmem:[%s4137_s4 + $0x190] sm:$0xf] }
 0x1fd   :  { %2871 = vrot.lane.b32.xlu0 %v2870_v6, %s3003_s15  ;;  %v824_v21 = vsel %vm123_vm3, %v822_v19, %v823_v16  ;;  %v827_v3 = vsel %vm123_vm3, %v823_v16, %v820_v7  ;;  %v826_v24 = vsel %vm123_vm3, %v820_v7, %v821_v20  ;;  %v2300_v14 = vor.u32 %v2685_v12, %v2299_v11  ;;  %v2670_v6 = vld [vmem:[%s4137_s4 + $0x14] sm:$0xf]  ;;  %v2245_v16 = vld [vmem:[%s4137_s4 + $0x18] sm:$0xf0]  ;;  %v2709_v41 = vld [vmem:[%s4137_s4 + $0x144] sm:$0xf0] }
 0x1fe   :  { %v2890_v23 = vpack.i.bf16 %v827_v3, %v824_v21  ;;  %v2885_v25 = vpack.i.bf16 %v825_v17, %v826_v24  ;;  %1261 = vmatpush.bf16.msrb.mxu0 %v2252_v44  ;;  %1335 = vmatpush.bf16.msra.mxu1 %v2272_v48  ;;  %v2256_v15 = vor.u32 %v2672_v60, %v2253_v63  ;;  %v2686_v19 = vld [vmem:[%s4137_s4 + $0x94] sm:$0xf]  ;;  %v2309_v7 = vld [vmem:[%s4137_s4 + $0x98] sm:$0xf0]  ;;  %v2235_v3 = vld [vmem:[%s4137_s4] sm:$0xf] }
 0x1ff   :  { %v2320_v2 = vor.u32 %v2688_v0, %v2317_v1  ;;  %1282 = vmatpush.bf16.msrb.mxu2 %v2300_v14  ;;  %v2248_v20 = vor.u32 %v2670_v6, %v2245_v16  ;;  %v2312_v21 = vor.u32 %v2686_v19, %v2309_v7  ;;  %v2669_v17 = vld [vmem:[%s4137_s4 + $0x4] sm:$0xf0]  ;;  %v2404_v39 = vor.u32 %v2711_v38, %v2403_v32  ;;  %v2719_v44 = vld [vmem:[%s4137_s4 + $0x194] sm:$0xf0]  ;;  %v2427_v50 = vld [vmem:[%s4137_s4 + $0x180] sm:$0xf] }
 0x200   :  { %v2236_v24 = vor.u32 %v2669_v17, %v2235_v3  ;;  %v2396_v42 = vor.u32 %v2709_v41, %v2395_v40  ;;  %v2436_v45 = vor.u32 %v2719_v44, %v2435_v43  ;;  %v2388_v48 = vor.u32 %v2707_v47, %v2387_v46  ;;  %v2703_v33 = vld [vmem:[%s4137_s4 + $0x114] sm:$0xf0]  ;;  %v2363_v56 = vld [vmem:[%s4137_s4 + $0x100] sm:$0xf]  ;;  %v2701_v57 = vld [vmem:[%s4137_s4 + $0x104] sm:$0xf0] }
 0x201   :  { %1356 = vmatpush.bf16.msra.mxu3 %v2320_v2  ;;  %v2380_v53 = vor.u32 %v2705_v49, %v2379_v13  ;;  %v2428_v54 = vor.u32 %v2717_v51, %v2427_v50  ;;  %v2364_v12 = vor.u32 %v2701_v57, %v2363_v56  ;;  %v2718_v22 = vld [vmem:[%s4137_s4 + $0x194] sm:$0xf]  ;;  %v2437_v29 = vld [vmem:[%s4137_s4 + $0x198] sm:$0xf0]  ;;  %v2397_v40 = vld [vmem:[%s4137_s4 + $0x148] sm:$0xf0] }
 0x202   :  { %1262 = vmatpush.bf16.msrb.mxu0 %v2244_v61  ;;  %1336 = vmatpush.bf16.msra.mxu1 %v2264_v55  ;;  %v2372_v55 = vor.u32 %v2703_v33, %v2371_v52  ;;  %v2405_v34 = vld [vmem:[%s4137_s4 + $0x158] sm:$0xf0]  ;;  %v2706_v51 = vld [vmem:[%s4137_s4 + $0x134] sm:$0xf]  ;;  %v2716_v52 = vld [vmem:[%s4137_s4 + $0x184] sm:$0xf] }
 0x203   :  { %1318 = vmatpush.bf16.msra.mxu2 %v1251_v18  ;;  %v2429_v33 = vld [vmem:[%s4137_s4 + $0x188] sm:$0xf0] }
 0x204   :  { %2891 = vrot.lane.b32.xlu1 %v2890_v23, %s3004_s18  ;;  %v2668_v23 = vld [vmem:[%s4137_s4 + $0x4] sm:$0xf]  ;;  %v2432_v56 = vor.u32 %v2716_v52, %v2429_v33 }
 0x205   :  { %2886 = vrot.lane.b32.xlu0 %v2885_v25, %s3004_s18  ;;  %1357 = vmatpush.bf16.msra.mxu3 %v2312_v21  ;;  %v2237_v25 = vld [vmem:[%s4137_s4 + $0x8] sm:$0xf0] }
 0x206   :  { %1337 = vmatpush.bf16.msra.mxu1 %v2256_v15  ;;  %v2240_v28 = vor.u32 %v2668_v23, %v2237_v25  ;;  %1263 = vmatpush.bf16.msrb.mxu0 %v2236_v24  ;;  %v1135_v23 = vunpack.c.h.b16 %v3759_v31  ;;  %v2712_v24 = vld [vmem:[%s4137_s4 + $0x164] sm:$0xf]  ;;  %v2413_v25 = vld [vmem:[%s4137_s4 + $0x168] sm:$0xf0]  ;;  %v2710_v31 = vld [vmem:[%s4137_s4 + $0x154] sm:$0xf] }
 0x207   :  { %1319 = vmatpush.bf16.msra.mxu2 %v2436_v45  ;;  %v2408_v18 = vor.u32 %v2710_v31, %v2405_v34  ;;  %v2721_v34 = vld [vmem:[%s4139_s6 + $0x8] sm:$0xff] }
 0x209   :  { %1358 = vmatpush.bf16.msra.mxu3 %v2304_v4  ;;  %v2416_v4 = vor.u32 %v2712_v24, %v2413_v25 }
 0x20a   :  { %1338 = vmatpush.bf16.msra.mxu1 %v2248_v20  ;;  %1294 = vmatpush.bf16.msra.mxu0 %v2420_v30 }
 0x20b   :  { %1320 = vmatpush.bf16.msra.mxu2 %v2428_v54  ;;  %v2381_v54 = vld [vmem:[%s4137_s4 + $0x128] sm:$0xf0] }
 0x20e   :  { %1339 = vmatpush.bf16.msra.mxu1 %v2240_v28  ;;  %1295 = vmatpush.bf16.msra.mxu0 %v2412_v9  ;;  %v1189_v28 = vpack.c.b16 %v1135_v23, %v1135_v23  ;;  %v2440_v9 = vor.u32 %v2718_v22, %v2437_v29  ;;  %v2726_v23 = vld [vmem:[%s4139_s6 + $0x30] sm:$0xff]  ;;  %v2723_v22 = vld [vmem:[%s4139_s6 + $0x18] sm:$0xff] }
 0x20f   :  { %v2722_v29 = vld [vmem:[%s4139_s6 + $0x10] sm:$0xff] }
 0x210   :  { %v1254_v32 = vsel %vm1249_vm10, %v1189_v28, 0 }
 0x212   :  { %1296 = vmatpush.bf16.msra.mxu0 %v2404_v39  ;;  %v2708_v39 = vld [vmem:[%s4137_s4 + $0x144] sm:$0xf] }
 0x213   :  { %v2400_v47 = vor.u32 %v2708_v39, %v2397_v40 }
 0x216   :  { %1297 = vmatpush.bf16.msra.mxu0 %v2396_v42 }
 0x21a   :  { %1298 = vmatpush.bf16.msra.mxu0 %v2388_v48 }
 0x21e   :  { %1299 = vmatpush.bf16.msra.mxu0 %v2380_v53  ;;  %v2704_v53 = vld [vmem:[%s4137_s4 + $0x124] sm:$0xf] }
 0x222   :  { %1300 = vmatpush.bf16.msra.mxu0 %v2372_v55  ;;  %v2384_v55 = vor.u32 %v2704_v53, %v2381_v54 }
 0x226   :  { %1301 = vmatpush.bf16.msra.mxu0 %v2364_v12  ;;  %v2365_v12 = vld [vmem:[%s4137_s4 + $0x108] sm:$0xf0] }
 0x24d   :  { %v3817_v5 = vpop.permute.xlu2 %2866 }
 0x24e   :  { %v2869_v14 = vunpack.i.h.bf16 %v3817_v5  ;;  %v2868_v15 = vunpack.i.l.bf16 %v3817_v5 }
 0x256   :  { %v2882_v38 = vpop.permute.xlu2 %2881 }
 0x257   :  { %v2884_v43 = vunpack.i.h.bf16 %v2882_v38  ;;  %v2883_v44 = vunpack.i.l.bf16 %v2882_v38 }
 0x265   :  { %v2862_v60 = vpop.permute.xlu1 %2861 }
 0x266   :  { %v2864_v61 = vunpack.i.h.bf16 %v2862_v60  ;;  %v2863_v63 = vunpack.i.l.bf16 %v2862_v60  ;;  %v2857_v0 = vpop.permute.xlu0 %2856  ;;  %v2702_v60 = vld [vmem:[%s4137_s4 + $0x114] sm:$0xf] }
 0x267   :  { %v2859_v1 = vunpack.i.h.bf16 %v2857_v0  ;;  %v2858_v11 = vunpack.i.l.bf16 %v2857_v0 }
 0x269   :  { %v897_v2 = vsel %vm673_vm8, %v2859_v1, %v2864_v61  ;;  %v896_v6 = vsel %vm673_vm8, %v2858_v11, %v2863_v63  ;;  %v892_v16 = vsel %vm780_vm9, %v3479_v62, %v2858_v11  ;;  %v893_v19 = vsel %vm780_vm9, %v3481_v59, %v2859_v1  ;;  %v2714_v62 = vld [vmem:[%s4137_s4 + $0x174] sm:$0xf]  ;;  %v2421_v59 = vld [vmem:[%s4137_s4 + $0x178] sm:$0xf0]  ;;  %v2700_v11 = vld [vmem:[%s4137_s4 + $0x104] sm:$0xf] }
 0x26a   :  { %v910_v7 = vpack.c.bf16 %v893_v19, %v892_v16  ;;  %v901_v20 = vsel %vm900_vm11, %v896_v6, %v2868_v15  ;;  %v902_v21 = vsel %vm900_vm11, %v897_v2, %v2869_v14  ;;  %v2424_v17 = vor.u32 %v2714_v62, %v2421_v59  ;;  %v2373_v61 = vld [vmem:[%s4137_s4 + $0x118] sm:$0xf0] }
 0x26b   :  { %v911_v3 = vpack.c.bf16 %v902_v21, %v901_v20  ;;  %v2376_v1 = vor.u32 %v2702_v60, %v2373_v61  ;;  %v2368_v16 = vor.u32 %v2700_v11, %v2365_v12 }
 0x26c   :  { %1264 = vmatmul.bf16.vlgmr.msrb.gmra.mxu0 %v910_v7  ;;  %1340 = vmatmul.bf16.vlgmr.msra.gmra.mxu1 %v910_v7 }
 0x26d   :  { %1283 = vmatmul.bf16.vlgmr.msrb.gmra.mxu2 %v911_v3  ;;  %1359 = vmatmul.bf16.vlgmr.msra.gmra.mxu3 %v911_v3 }
 0x26e   :  { %v2877_v26 = vpop.permute.xlu1 %2876  ;;  %1370 = vmatpush.bf16.msrb.mxu0 %v2424_v17  ;;  %1394 = vmatpush.bf16.msrb.mxu2 %v1254_v32  ;;  %v2727_v17 = vld [vmem:[%s4139_s6 + $0x38] sm:$0xff] }
 0x26f   :  { %v2872_v27 = vpop.permute.xlu0 %2871  ;;  %v2879_v30 = vunpack.i.h.bf16 %v2877_v26  ;;  %v2878_v35 = vunpack.i.l.bf16 %v2877_v26  ;;  %1530 = vmatpush.bf16.msrb.mxu1 %v2727_v17  ;;  %v2725_v26 = vld [vmem:[%s4139_s6 + $0x28] sm:$0xff] }
 0x270   :  { %v2874_v36 = vunpack.i.h.bf16 %v2872_v27  ;;  %v2873_v37 = vunpack.i.l.bf16 %v2872_v27  ;;  %v2724_v27 = vld [vmem:[%s4139_s6 + $0x20] sm:$0xff] }
 0x272   :  { %1371 = vmatpush.bf16.msrb.mxu0 %v2416_v4  ;;  %v898_v41 = vsel %vm673_vm8, %v2873_v37, %v2878_v35  ;;  %v899_v42 = vsel %vm673_vm8, %v2874_v36, %v2879_v30  ;;  %1395 = vmatpush.bf16.msrb.mxu2 %v2440_v9  ;;  %v894_v45 = vsel %vm780_vm9, %v3547_v10, %v2873_v37  ;;  %v2389_v10 = vld [vmem:[%s4137_s4 + $0x138] sm:$0xf0]  ;;  %v971_v35 = vld [vmem:[%s4138_s5] sm:$0x3]  ;;  %s3005_s4 = smov 112  }
 0x273   :  { %v895_v46 = vsel %vm780_vm9, %v3587_v58, %v2874_v36  ;;  %v903_v48 = vsel %vm900_vm11, %v898_v41, %v2883_v44  ;;  %v904_v13 = vsel %vm900_vm11, %v899_v42, %v2884_v43  ;;  %v2392_v58 = vor.u32 %v2706_v51, %v2389_v10  ;;  %1531 = vmatpush.bf16.msrb.mxu1 %v2726_v23  ;;  %v2720_v37 = vld [vmem:[%s4139_s6] sm:$0xff] }
 0x274   :  { %v914_v49 = vpack.c.bf16 %v895_v46, %v894_v45  ;;  %v915_v50 = vpack.c.bf16 %v904_v13, %v903_v48  ;;  %v973_v36 = vperm.slane %v971_v35, 0 }
 0x276   :  { %1372 = vmatpush.bf16.msrb.mxu0 %v2408_v18  ;;  %1396 = vmatpush.bf16.msrb.mxu2 %v2432_v56  ;;  %v2892_v20 = vpop.permute.xlu1 %2891 }
 0x277   :  { %v2887_v57 = vpop.permute.xlu0 %2886  ;;  %v2894_v21 = vunpack.i.h.bf16 %v2892_v20  ;;  %v2893_v3 = vunpack.i.l.bf16 %v2892_v20  ;;  %1532 = vmatpush.bf16.msrb.mxu1 %v2725_v26 }
 0x278   :  { %v2889_v63 = vunpack.i.h.bf16 %v2887_v57  ;;  %v2888_v0 = vunpack.i.l.bf16 %v2887_v57 }
 0x279   :  { %v908_v62 = vsel %vm905_vm12, %v2883_v44, %v2893_v3  ;;  %v917_v5 = vpack.c.bf16 %v2894_v21, %v2893_v3  ;;  %v2729_v44 = vld [vmem:[%s4139_s6 + $0x48] sm:$0xff] }
 0x27a   :  { %1373 = vmatpush.bf16.msrb.mxu0 %v2400_v47  ;;  %v907_v2 = vsel %vm905_vm12, %v2869_v14, %v2889_v63  ;;  %v906_v6 = vsel %vm905_vm12, %v2868_v15, %v2888_v0  ;;  %v913_v7 = vpack.c.bf16 %v2889_v63, %v2888_v0  ;;  %v909_v14 = vsel %vm905_vm12, %v2884_v43, %v2894_v21 }
 0x27b   :  { %v912_v19 = vpack.c.bf16 %v907_v2, %v906_v6  ;;  %v916_v59 = vpack.c.bf16 %v909_v14, %v908_v62  ;;  %1533 = vmatpush.bf16.msrb.mxu1 %v2724_v27  ;;  %1555 = vmatpush.bf16.msrb.mxu3 %v2729_v44  ;;  %v974_v2 = vperm.slane %v971_v35, 1 }
 0x27c   :  { %1269 = vmatmul.bf16.gmra.mxu0 %v914_v49  ;;  %1345 = vmatmul.bf16.gmra.mxu1 %v914_v49 }
 0x27d   :  { %1288 = vmatmul.bf16.gmra.mxu2 %v915_v50  ;;  %1364 = vmatmul.bf16.gmra.mxu3 %v915_v50 }
 0x27e   :  { %1374 = vmatpush.bf16.msrb.mxu0 %v2392_v58 }
 0x27f   :  { %1534 = vmatpush.bf16.msrb.mxu1 %v2723_v22 }
 0x282   :  { %1375 = vmatpush.bf16.msrb.mxu0 %v2384_v55 }
 0x283   :  { %1535 = vmatpush.bf16.msrb.mxu1 %v2722_v29 }
 0x286   :  { %1376 = vmatpush.bf16.msrb.mxu0 %v2376_v1 }
 0x287   :  { %1536 = vmatpush.bf16.msrb.mxu1 %v2721_v34 }
 0x28a   :  { %1377 = vmatpush.bf16.msrb.mxu0 %v2368_v16  ;;  %v2728_v16 = vld [vmem:[%s4139_s6 + $0x40] sm:$0xff] }
 0x28b   :  { %1537 = vmatpush.bf16.msrb.mxu1 %v2720_v37  ;;  %1556 = vmatpush.bf16.msrb.mxu3 %v2728_v16 }
 0x28c   :  { %1302 = vmatmul.bf16.vlgmr.msra.gmra.mxu0 %v912_v19 }
 0x28d   :  { %2441 = vmatmul.msk.bf16.vlgmr.msra.gmra.mxu2 %vm1242_vm13, %v913_v7 }
 0x29c   :  { %1307 = vmatmul.bf16.gmra.mxu0 %v916_v59 }
 0x29d   :  { %2442 = vmatmul.msk.bf16.gmra.mxu2 %vm1242_vm13, %v917_v5 }
 0x2ac   :  { %1378 = vmatmul.bf16.vlgmr.msrb.gmra.mxu0 %v912_v19 }
 0x2ad   :  { %2443 = vmatmul.msk.bf16.vlgmr.msrb.gmra.mxu2 %vm1242_vm13, %v913_v7 }
 0x2bc   :  { %1383 = vmatmul.bf16.gmra.mxu0 %v916_v59 }
 0x2bd   :  { %2444 = vmatmul.msk.bf16.gmra.mxu2 %vm1242_vm13, %v917_v5 }
 0x2e9   :  { %v1265_v15 = vpop.f32.mrf.mxu0  ;;  %v1341_v55 = vpop.f32.mrf.mxu1 }
 0x2ea   :  { %v1266_v38 = vadd.f32 %v1265_v15, %v973_v36  ;;  %v1342_v3 = vadd.f32 %v1341_v55, %v974_v2 }
 0x2f0   :  { %v1284_v24 = vpop.f32.mrf.mxu2  ;;  %v1360_v61 = vpop.f32.mrf.mxu3 }
 0x2f1   :  { %v1267_v25 = vpop.f32.mrf.mxu0  ;;  %v1285_v18 = vadd.f32 %v1284_v24, %v1266_v38  ;;  %v1343_v14 = vpop.f32.mrf.mxu1  ;;  %v1361_v59 = vadd.f32 %v1360_v61, %v1342_v3 }
 0x2f2   :  { %v1268_v43 = vadd.f32 %v1267_v25, %v973_v36 }
 0x2f8   :  { %v1286_v28 = vpop.f32.mrf.mxu2  ;;  %v1362_v5 = vpop.f32.mrf.mxu3 }
 0x2f9   :  { %v1270_v4 = vpop.f32.mrf.mxu0  ;;  %v1287_v45 = vadd.f32 %v1286_v28, %v1268_v43  ;;  %v1344_v28 = vadd.f32 %v1343_v14, %v974_v2 }
 0x2fa   :  { %v1271_v50 = vadd.f32 %v1270_v4, %v973_v36 }
 0x2fb   :  { %v1363_v22 = vadd.f32 %v1362_v5, %v1344_v28 }
 0x300   :  { %v1289_v30 = vpop.f32.mrf.mxu2 }
 0x301   :  { %v1272_v31 = vpop.f32.mrf.mxu0  ;;  %v1290_v10 = vadd.f32 %v1289_v30, %v1271_v50  ;;  %v1346_v30 = vpop.f32.mrf.mxu1 }
 0x302   :  { %v1273_v60 = vadd.f32 %v1272_v31, %v973_v36  ;;  %v1365_v36 = vpop.f32.mrf.mxu3 }
 0x308   :  { %v1291_v32 = vpop.f32.mrf.mxu2 }
 0x309   :  { %v1303_v9 = vpop.f32.mrf.mxu0  ;;  %v1292_v0 = vadd.f32 %v1291_v32, %v1273_v60  ;;  %v1348_v43 = vpop.f32.mrf.mxu1 }
 0x30a   :  { %v1304_v39 = vadd.f32 %v1303_v9, %v1285_v18  ;;  %v1347_v18 = vadd.f32 %v1346_v30, %v974_v2  ;;  %v2745_v30 = vld [vmem:[%s4140_s7 + $0x78] sm:$0xff] }
 0x30b   :  { %1874 = vmatpush.bf16.msra.mxu2 %v2745_v30 }
 0x310   :  { %v1322_v40 = vpop.f32.mrf.mxu2 }
 0x311   :  { %v1323_v41 = vadd.f32 %v1322_v40, %v1304_v39  ;;  %v1305_v42 = vpop.f32.mrf.mxu0  ;;  %v1366_v40 = vadd.f32 %v1365_v36, %v1347_v18  ;;  %v2734_v18 = vld [vmem:[%s4140_s7 + $0x20] sm:$0xff] }
 0x312   :  { %v1306_v47 = vadd.f32 %v1305_v42, %v1287_v45 }
 0x313   :  { %v1408_v46 = vmul.f32 0.5, %v1323_v41 }
 0x315   :  { %2950 = vtanh.f32 %v1408_v46  ;;  %v1367_v46 = vpop.f32.mrf.mxu3 }
 0x318   :  { %v1324_v48 = vpop.f32.mrf.mxu2 }
 0x319   :  { %v1325_v13 = vadd.f32 %v1324_v48, %v1306_v47  ;;  %v1308_v49 = vpop.f32.mrf.mxu0 }
 0x31a   :  { %v1309_v53 = vadd.f32 %v1308_v49, %v1290_v10 }
 0x31b   :  { %v1410_v51 = vmul.f32 0.5, %v1325_v13  ;;  %v2951_v58 = vpop.eup %2950  ;;  %v1349_v13 = vadd.f32 %v1348_v43, %v974_v2 }
 0x31c   :  { %v1424_v56 = vmul.f32 0.5, %v2951_v58 }
 0x31d   :  { %2952 = vtanh.f32 %v1410_v51  ;;  %v1368_v51 = vadd.f32 %v1367_v46, %v1349_v13 }
 0x31e   :  { %v1432_v11 = vadd.f32 0.5, %v1424_v56 }
 0x320   :  { %v1327_v54 = vpop.f32.mrf.mxu2 }
 0x321   :  { %v1328_v52 = vadd.f32 %v1327_v54, %v1309_v53  ;;  %v1310_v33 = vpop.f32.mrf.mxu0 }
 0x322   :  { %v1311_v6 = vadd.f32 %v1310_v33, %v1292_v0 }
 0x323   :  { %v2953_v57 = vpop.eup %2952  ;;  %v1412_v1 = vmul.f32 0.5, %v1328_v52 }
 0x324   :  { %v1426_v63 = vmul.f32 0.5, %v2953_v57 }
 0x325   :  { %2954 = vtanh.f32 %v1412_v1 }
 0x326   :  { %v1434_v12 = vadd.f32 0.5, %v1426_v63 }
 0x328   :  { %v1440_v19 = vpack.c.bf16 %v1434_v12, %v1432_v11  ;;  %v1329_v7 = vpop.f32.mrf.mxu2 }
 0x329   :  { %v1330_v20 = vadd.f32 %v1329_v7, %v1311_v6  ;;  %v1379_v21 = vpop.f32.mrf.mxu0 }
 0x32a   :  { %1538 = vmatmul.bf16.vlgmr.msrb.gmra.mxu1 %v1440_v19  ;;  %v1380_v17 = vadd.f32 %v1379_v21, %v1361_v59 }
 0x32b   :  { %v1414_v62 = vmul.f32 0.5, %v1330_v20  ;;  %v2955_v15 = vpop.eup %2954 }
 0x32c   :  { %v1428_v26 = vmul.f32 0.5, %v2955_v15 }
 0x32d   :  { %2956 = vtanh.f32 %v1414_v62 }
 0x32e   :  { %v1436_v31 = vadd.f32 0.5, %v1428_v26 }
 0x330   :  { %v1398_v23 = vpop.f32.mrf.mxu2 }
 0x331   :  { %v1399_v24 = vadd.f32 %v1398_v23, %v1380_v17  ;;  %v1381_v25 = vpop.f32.mrf.mxu0 }
 0x332   :  { %v1382_v35 = vadd.f32 %v1381_v25, %v1363_v22 }
 0x333   :  { %v2957_v27 = vpop.eup %2956  ;;  %v1409_v29 = vmul.f32 0.5, %v1399_v24 }
 0x334   :  { %v1430_v4 = vmul.f32 0.5, %v2957_v27 }
 0x335   :  { %2958 = vtanh.f32 %v1409_v29  ;;  %v2736_v29 = vld [vmem:[%s4140_s7 + $0x30] sm:$0xff] }
 0x336   :  { %v1438_v34 = vadd.f32 0.5, %v1430_v4  ;;  %v2737_v4 = vld [vmem:[%s4140_s7 + $0x38] sm:$0xff] }
 0x337   :  { %1860 = vmatpush.bf16.msra.mxu0 %v2737_v4 }
 0x338   :  { %v1400_v37 = vpop.f32.mrf.mxu2  ;;  %v1442_v32 = vpack.c.bf16 %v1438_v34, %v1436_v31  ;;  %v2753_v31 = vld [vmem:[%s4140_s7 + $0xb8] sm:$0xff] }
 0x339   :  { %v1401_v9 = vadd.f32 %v1400_v37, %v1382_v35  ;;  %v1384_v38 = vpop.f32.mrf.mxu0  ;;  %1888 = vmatpush.bf16.msra.mxu1 %v2753_v31 }
 0x33a   :  { %1543 = vmatmul.bf16.gmra.mxu1 %v1442_v32  ;;  %v1385_v42 = vadd.f32 %v1384_v38, %v1366_v40  ;;  %v2735_v32 = vld [vmem:[%s4140_s7 + $0x28] sm:$0xff]  ;;  %v2733_v40 = vld [vmem:[%s4140_s7 + $0x18] sm:$0xff] }
 0x33b   :  { %v1411_v39 = vmul.f32 0.5, %v1401_v9  ;;  %v2959_v41 = vpop.eup %2958  ;;  %1861 = vmatpush.bf16.msra.mxu0 %v2736_v29 }
 0x33c   :  { %v1425_v47 = vmul.f32 0.5, %v2959_v41 }
 0x33d   :  { %2960 = vtanh.f32 %v1411_v39  ;;  %1889 = vmatpush.bf16.msra.mxu1 %v2752_v8 }
 0x33e   :  { %v1433_v58 = vadd.f32 0.5, %v1425_v47  ;;  %v2732_v47 = vld [vmem:[%s4140_s7 + $0x10] sm:$0xff] }
 0x33f   :  { %1862 = vmatpush.bf16.msra.mxu0 %v2735_v32 }
 0x340   :  { %v1403_v44 = vpop.f32.mrf.mxu2 }
 0x341   :  { %v1404_v45 = vadd.f32 %v1403_v44, %v1385_v42  ;;  %v1386_v50 = vpop.f32.mrf.mxu0 }
 0x342   :  { %v1387_v54 = vadd.f32 %v1386_v50, %v1368_v51 }
 0x343   :  { %v2961_v48 = vpop.eup %2960  ;;  %v1413_v10 = vmul.f32 0.5, %v1404_v45  ;;  %1863 = vmatpush.bf16.msra.mxu0 %v2734_v18 }
 0x344   :  { %v1427_v49 = vmul.f32 0.5, %v2961_v48 }
 0x345   :  { %2962 = vtanh.f32 %v1413_v10 }
 0x346   :  { %v1435_v53 = vadd.f32 0.5, %v1427_v49 }
 0x347   :  { %1864 = vmatpush.bf16.msra.mxu0 %v2733_v40 }
 0x348   :  { %v1441_v52 = vpack.c.bf16 %v1435_v53, %v1433_v58  ;;  %v1405_v33 = vpop.f32.mrf.mxu2 }
 0x349   :  { %v1406_v55 = vadd.f32 %v1405_v33, %v1387_v54  ;;  %v2731_v33 = vld [vmem:[%s4140_s7 + $0x8] sm:$0xff] }
 0x34a   :  { %2485 = vmatmul.msk.bf16.vlgmr.msrb.gmra.mxu3 %vm228_vm4, %v1441_v52 }
 0x34b   :  { %v1415_v56 = vmul.f32 0.5, %v1406_v55  ;;  %v2963_v57 = vpop.eup %2962  ;;  %1865 = vmatpush.bf16.msra.mxu0 %v2732_v47  ;;  %v2758_v47 = vld [vmem:[%s4142_s9 + $0x18] sm:$0xff] }
 0x34c   :  { %v1429_v60 = vmul.f32 0.5, %v2963_v57 }
 0x34d   :  { %2964 = vtanh.f32 %v1415_v56 }
 0x34e   :  { %v1437_v0 = vadd.f32 0.5, %v1429_v60 }
 0x34f   :  { %1866 = vmatpush.bf16.msra.mxu0 %v2731_v33 }
 0x353   :  { %v2965_v61 = vpop.eup %2964 }
 0x354   :  { %v1431_v63 = vmul.f32 0.5, %v2965_v61 }
 0x356   :  { %v1439_v1 = vadd.f32 0.5, %v1431_v63  ;;  %v1943_v63 = vld [vmem:[%s4142_s9 + $0x38] sm:$0xf] }
 0x358   :  { %v1443_v11 = vpack.c.bf16 %v1439_v1, %v1437_v0  ;;  %v1977_v0 = vunpack.c.l.b16 %v1943_v63 }
 0x35a   :  { %2486 = vmatmul.msk.bf16.gmra.mxu3 %vm228_vm4, %v1443_v11  ;;  %v1985_v1 = vpack.c.b16 %v1977_v0, %v1977_v0 }
 0x35c   :  { %v1997_v11 = vsel %vm686_vm7, %v1985_v1, 0 }
 0x3a7   :  { %v1539_v12 = vpop.f32.mrf.mxu1 }
 0x3af   :  { %v1541_v6 = vpop.f32.mrf.mxu1 }
 0x3b7   :  { %v1544_v62 = vpop.f32.mrf.mxu1 }
 0x3bf   :  { %v1546_v25 = vpop.f32.mrf.mxu1 }
 0x3cd   :  { %v1558_v2 = vpop.f32.mrf.mxu3 }
 0x3ce   :  { %v1559_v16 = vadd.f32 %v1558_v2, %v1539_v12  ;;  %v2730_v12 = vld [vmem:[%s4140_s7] sm:$0xff]  ;;  %v2744_v2 = vld [vmem:[%s4140_s7 + $0x70] sm:$0xff] }
 0x3cf   :  { %1867 = vmatpush.bf16.msra.mxu0 %v2730_v12  ;;  %1875 = vmatpush.bf16.msra.mxu2 %v2744_v2 }
 0x3d0   :  { %v1568_v20 = vrot.slane %v1559_v16, 1 }
 0x3d3   :  { %1999 = vmatpush.bf16.msrb.mxu0 %v1997_v11 }
 0x3d5   :  { %v1560_v19 = vpop.f32.mrf.mxu3 }
 0x3d6   :  { %v1561_v7 = vadd.f32 %v1560_v19, %v1541_v6  ;;  %v2754_v6 = vld [vmem:[%s4140_s7 + $0xc0] sm:$0xff]  ;;  %v2751_v19 = vld [vmem:[%s4140_s7 + $0xa8] sm:$0xff] }
 0x3d7   :  { %1909 = vmatpush.bf16.msra.mxu3 %v2754_v6  ;;  %1890 = vmatpush.bf16.msra.mxu1 %v2751_v19 }
 0x3d8   :  { %v1569_v21 = vrot.slane %v1561_v7, 1 }
 0x3da   :  { %v1574_v3 = vsel %vm72_vm0, %v1568_v20, %v1569_v21 }
 0x3db   :  { %v1576_v14 = vadd.f32 %v1574_v3, %v1559_v16  ;;  %v2743_v16 = vld [vmem:[%s4140_s7 + $0x68] sm:$0xff]  ;;  %v2749_v3 = vld [vmem:[%s4140_s7 + $0x98] sm:$0xff] }
 0x3dc   :  { %1876 = vmatpush.bf16.msra.mxu2 %v2743_v16  ;;  %v2766_v16 = vld [vmem:[%s4144_s11 + $0x20] sm:$0xff] }
 0x3dd   :  { %v1580_v59 = vmul.f32 0.5, %v1576_v14  ;;  %v1563_v5 = vpop.f32.mrf.mxu3  ;;  %v2740_v14 = vld [vmem:[%s4140_s7 + $0x50] sm:$0xff] }
 0x3de   :  { %v1564_v15 = vadd.f32 %v1563_v5, %v1544_v62  ;;  %v2748_v62 = vld [vmem:[%s4140_s7 + $0x90] sm:$0xff]  ;;  %v2739_v5 = vld [vmem:[%s4140_s7 + $0x48] sm:$0xff] }
 0x3df   :  { %1584 = vst.msk [vmem:[#allocation3] sm:$0xff] %vm905_vm12, %v1580_v59  ;;  %v2747_v59 = vld [vmem:[%s4140_s7 + $0x88] sm:$0xff] }
 0x3e0   :  { %v1570_v17 = vrot.slane %v1564_v15, 1 }
 0x3e2   :  { %v1573_v23 = vsel %vm72_vm0, %v1569_v21, %v1570_v17  ;;  %v2741_v21 = vld [vmem:[%s4140_s7 + $0x58] sm:$0xff] }
 0x3e3   :  { %v1577_v24 = vadd.f32 %v1573_v23, %v1561_v7  ;;  %v2750_v7 = vld [vmem:[%s4140_s7 + $0xa0] sm:$0xff] }
 0x3e4   :  { %1891 = vmatpush.bf16.msra.mxu1 %v2750_v7 }
 0x3e5   :  { %v1581_v26 = vmul.f32 0.5, %v1577_v24  ;;  %v1565_v27 = vpop.f32.mrf.mxu3 }
 0x3e6   :  { %v1566_v28 = vadd.f32 %v1565_v27, %v1546_v25 }
 0x3e7   :  { %1585 = vst.msk [vmem:[#allocation3 + $0x8] sm:$0xff] %vm905_vm12, %v1581_v26 }
 0x3e8   :  { %v1571_v22 = vrot.slane %v1566_v28, 1  ;;  %1892 = vmatpush.bf16.msra.mxu1 %v2749_v3 }
 0x3ea   :  { %v1572_v34 = vsel %vm72_vm0, %v1570_v17, %v1571_v22  ;;  %v1575_v35 = vsel %vm72_vm0, %v1571_v22, %v1568_v20  ;;  %v2742_v20 = vld [vmem:[%s4140_s7 + $0x60] sm:$0xff] }
 0x3eb   :  { %v1578_v36 = vadd.f32 %v1572_v34, %v1564_v15  ;;  %v1579_v37 = vadd.f32 %v1575_v35, %v1566_v28  ;;  %1877 = vmatpush.bf16.msra.mxu2 %v2742_v20  ;;  %v2746_v15 = vld [vmem:[%s4140_s7 + $0x80] sm:$0xff] }
 0x3ec   :  { %1893 = vmatpush.bf16.msra.mxu1 %v2748_v62  ;;  %v2738_v17 = vld [vmem:[%s4140_s7 + $0x40] sm:$0xff] }
 0x3ed   :  { %v1582_v9 = vmul.f32 0.5, %v1578_v36  ;;  %v1583_v38 = vmul.f32 0.5, %v1579_v37 }
 0x3ee   :  { %v3980_v39 = vld [vmem:[#allocation3] ss:$2 sm:$0xff] }
 0x3ef   :  { %1586 = vst.msk [vmem:[#allocation3 + $0x10] sm:$0xff] %vm905_vm12, %v1582_v9  ;;  %v1599_v42 = vrot.slane %v3980_v39, 3  ;;  %v1595_v44 = vrot.slane %v3980_v39, 2  ;;  %v1591_v48 = vrot.slane %v3980_v39, 1  ;;  %v1603_v56 = vrot.slane %v3980_v39, 4  ;;  %1878 = vmatpush.bf16.msra.mxu2 %v2741_v21 }
 0x3f0   :  { %1587 = vst.msk [vmem:[#allocation3 + $0x18] sm:$0xff] %vm905_vm12, %v1583_v38  ;;  %1894 = vmatpush.bf16.msra.mxu1 %v2747_v59 }
 0x3f3   :  { %1879 = vmatpush.bf16.msra.mxu2 %v2740_v14 }
 0x3f4   :  { %1895 = vmatpush.bf16.msra.mxu1 %v2746_v15 }
 0x3f7   :  { %v3985_v41 = vld [vmem:[#allocation3 + $0x10] ss:$2 sm:$0xff]  ;;  %1880 = vmatpush.bf16.msra.mxu2 %v2739_v5 }
 0x3f8   :  { %v1600_v43 = vrot.slane %v3985_v41, 3  ;;  %v1596_v45 = vrot.slane %v3985_v41, 2  ;;  %v1592_v46 = vrot.slane %v3985_v41, 1  ;;  %v1604_v55 = vrot.slane %v3985_v41, 4 }
 0x3fa   :  { %v1601_v13 = vsel %vm106_vm1, %v1599_v42, %v1600_v43  ;;  %v1602_v49 = vsel %vm106_vm1, %v1600_v43, %v1599_v42  ;;  %v1597_v50 = vsel %vm89_vm2, %v1595_v44, %v1596_v45  ;;  %v1598_v51 = vsel %vm89_vm2, %v1596_v45, %v1595_v44  ;;  %v2761_v44 = vld [vmem:[%s4142_s9 + $0x30] sm:$0xff]  ;;  %v2760_v45 = vld [vmem:[%s4142_s9 + $0x28] sm:$0xff] }
 0x3fb   :  { %v2905_v10 = vpack.i.bf16 %v1602_v49, %v1601_v13  ;;  %v2900_v58 = vpack.i.bf16 %v1598_v51, %v1597_v50  ;;  %v1593_v53 = vsel %vm72_vm0, %v1591_v48, %v1592_v46  ;;  %v1594_v54 = vsel %vm72_vm0, %v1592_v46, %v1591_v48  ;;  %1881 = vmatpush.bf16.msra.mxu2 %v2738_v17  ;;  %v2759_v46 = vld [vmem:[%s4142_s9 + $0x20] sm:$0xff]  ;;  %v2757_v13 = vld [vmem:[%s4142_s9 + $0x10] sm:$0xff]  ;;  %v2756_v50 = vld [vmem:[%s4142_s9 + $0x8] sm:$0xff] }
 0x3fc   :  { %v2895_v52 = vpack.i.bf16 %v1594_v54, %v1593_v53  ;;  %v1605_v57 = vsel %vm123_vm3, %v1603_v56, %v1604_v55  ;;  %v1606_v60 = vsel %vm123_vm3, %v1604_v55, %v1603_v56  ;;  %2000 = vmatpush.bf16.msrb.mxu0 %v2761_v44  ;;  %v2915_v49 = vld [vmem:[%s4141_s8] ss:$0 sm:$0xff]  ;;  %vm1924_vm0 = vcmask 982016   ;;  %v2765_v17 = vld [vmem:[%s4144_s11 + $0x18] sm:$0xff] }
 0x3fd   :  { %2906 = vrot.lane.b32.xlu1 %v2905_v10, %s3005_s4  ;;  %2901 = vrot.lane.b32.xlu0 %v2900_v58, %s2998_s16  ;;  %v2910_v61 = vpack.i.bf16 %v1606_v60, %v1605_v57  ;;  %v2755_v54 = vld [vmem:[%s4142_s9] sm:$0xff]  ;;  %v2027_v57 = vld [vmem:[%s4144_s11 + $0x28] sm:$0x3] }
 0x3fe   :  { %2896 = vrot.lane.b32.xlu2 %v2895_v52, %s3004_s18  ;;  %v2053_v63 = vunpack.c.l.b16 %v2027_v57 }
 0x400   :  { %2001 = vmatpush.bf16.msrb.mxu0 %v2760_v45  ;;  %v2059_v11 = vpack.c.b16 %v2053_v63, %v2053_v63 }
 0x402   :  { %v2069_v2 = vsel %vm1249_vm10, %v2059_v11, 0 }
 0x403   :  { %2073 = vmatpush.bf16.msrb.mxu2 %v2069_v2 }
 0x404   :  { %2002 = vmatpush.bf16.msrb.mxu0 %v2759_v46 }
 0x406   :  { %2911 = vrot.lane.b32.xlu2 %v2910_v61, %s3000_s0 }
 0x407   :  { %2074 = vmatpush.bf16.msrb.mxu2 %v2766_v16 }
 0x408   :  { %2003 = vmatpush.bf16.msrb.mxu0 %v2758_v47 }
 0x40b   :  { %2075 = vmatpush.bf16.msrb.mxu2 %v2765_v17 }
 0x40c   :  { %2004 = vmatpush.bf16.msrb.mxu0 %v2757_v13 }
 0x410   :  { %2005 = vmatpush.bf16.msrb.mxu0 %v2756_v50 }
 0x414   :  { %2006 = vmatpush.bf16.msrb.mxu0 %v2755_v54 }
 0x458   :  { %v2897_v23 = vpop.permute.xlu2 %2896 }
 0x459   :  { %v2899_v24 = vunpack.i.h.bf16 %v2897_v23  ;;  %v2898_v25 = vunpack.i.l.bf16 %v2897_v23  ;;  %v2764_v23 = vld [vmem:[%s4144_s11 + $0x10] sm:$0xff] }
 0x45a   :  { %2076 = vmatpush.bf16.msrb.mxu2 %v2764_v23 }
 0x45b   :  { %v1640_v26 = vsel %vm905_vm12, %v3985_v41, %v2899_v24  ;;  %v1639_v27 = vsel %vm905_vm12, %v3980_v39, %v2898_v25 }
 0x45c   :  { %v1648_v28 = vpack.c.bf16 %v1640_v26, %v1639_v27  ;;  %v2916_v26 = vld [vmem:[%s4143_s10] ss:$0 sm:$0xff]  ;;  %s2092_s10 = sshll.u32 %s4146_s13, 4  ;;  %s2093_s10 = int_to_ptr.hbm [resolvable:$true] %s2092_s10 }
 0x45e   :  { %1868 = vmatmul.bf16.vlgmr.msra.gmra.mxu0 %v1648_v28 }
 0x460   :  { %v2912_v4 = vpop.permute.xlu2 %2911 }
 0x461   :  { %v2914_v22 = vunpack.i.h.bf16 %v2912_v4  ;;  %v2913_v29 = vunpack.i.l.bf16 %v2912_v4 }
 0x463   :  { %v1651_v30 = vpack.c.bf16 %v2914_v22, %v2913_v29 }
 0x465   :  { %2587 = vmatmul.msk.bf16.vlgmr.msra.gmra.mxu3 %vm1856_vm14, %v1651_v30 }
 0x46f   :  { %v2907_v31 = vpop.permute.xlu1 %2906  ;;  %v2902_v34 = vpop.permute.xlu0 %2901 }
 0x470   :  { %v2909_v35 = vunpack.i.h.bf16 %v2907_v31  ;;  %v2908_v36 = vunpack.i.l.bf16 %v2907_v31  ;;  %v2904_v37 = vunpack.i.h.bf16 %v2902_v34  ;;  %v2903_v32 = vunpack.i.l.bf16 %v2902_v34 }
 0x472   :  { %v1646_v9 = vsel %vm237_vm5, %v2908_v36, %v2913_v29  ;;  %v1647_v38 = vsel %vm237_vm5, %v2909_v35, %v2914_v22  ;;  %v1641_v18 = vsel %vm228_vm4, %v2898_v25, %v2903_v32  ;;  %v1642_v39 = vsel %vm228_vm4, %v2899_v24, %v2904_v37  ;;  %v2763_v24 = vld [vmem:[%s4144_s11 + $0x8] sm:$0xff]  ;;  %v2762_v25 = vld [vmem:[%s4144_s11] sm:$0xff]  ;;  %s3006_s11 = smov [#allocation5]  }
 0x473   :  { %v1650_v40 = vpack.c.bf16 %v1647_v38, %v1646_v9  ;;  %v1644_v41 = vsel %vm1643_vm15, %v1641_v18, %v2908_v36  ;;  %v1645_v42 = vsel %vm1643_vm15, %v1642_v39, %v2909_v35  ;;  %2077 = vmatpush.bf16.msrb.mxu2 %v2763_v24  ;;  %v2917_v35 = vld [vmem:[%s4145_s12] ss:$0 sm:$0xff]  ;;  %s2090_s28 = sshll.u32 %s3006_s11, 4  ;;  %s2091_s28 = int_to_ptr.vmem [resolvable:$true] %s2090_s28 }
 0x474   :  { %v1649_v43 = vpack.c.bf16 %v1645_v42, %v1644_v41 }
 0x475   :  { %1896 = vmatmul.bf16.vlgmr.msra.gmra.mxu1 %v1650_v40 }
 0x476   :  { %1882 = vmatmul.bf16.vlgmr.msra.gmra.mxu2 %v1649_v43 }
 0x477   :  { %2078 = vmatpush.bf16.msrb.mxu2 %v2762_v25 }
 0x4db   :  { %v1869_v48 = vpop.f32.mrf.mxu0 }
 0x4dc   :  { %v1870_v51 = vadd.f32 %v2915_v49, %v1869_v48 }
 0x4e3   :  { %v1871_v55 = vpop.f32.mrf.mxu0 }
 0x4e4   :  { %v1872_v60 = vadd.f32 %v2915_v49, %v1871_v55 }
 0x4e8   :  { %v1911_v52 = vpop.f32.mrf.mxu3 }
 0x4f0   :  { %v1913_v6 = vpop.f32.mrf.mxu3 }
 0x4f2   :  { %v1897_v10 = vpop.f32.mrf.mxu1 }
 0x4f9   :  { %v1883_v58 = vpop.f32.mrf.mxu2 }
 0x4fa   :  { %v1884_v53 = vadd.f32 %v1883_v58, %v1870_v51  ;;  %v1899_v12 = vpop.f32.mrf.mxu1 }
 0x4fc   :  { %v1898_v33 = vadd.f32 %v1897_v10, %v1884_v53 }
 0x4fe   :  { %v1912_v56 = vadd.f32 %v1911_v52, %v1898_v33 }
 0x500   :  { %v1916_v61 = vmul.f32 0.5, %v1912_v56 }
 0x501   :  { %v1885_v0 = vpop.f32.mrf.mxu2 }
 0x502   :  { %2966 = vtanh.f32 %v1916_v61  ;;  %v1886_v1 = vadd.f32 %v1885_v0, %v1872_v60 }
 0x504   :  { %v1900_v8 = vadd.f32 %v1899_v12, %v1886_v1 }
 0x506   :  { %v1914_v19 = vadd.f32 %v1913_v6, %v1900_v8 }
 0x508   :  { %v2967_v7 = vpop.eup %2966  ;;  %v1917_v20 = vmul.f32 0.5, %v1914_v19 }
 0x509   :  { %v1920_v21 = vmul.f32 0.5, %v2967_v7 }
 0x50a   :  { %2968 = vtanh.f32 %v1917_v20 }
 0x50b   :  { %v1922_v3 = vadd.f32 0.5, %v1920_v21 }
 0x50d   :  { %1925 = vst.msk [vmem:[#allocation4] sm:$0xff] %vm1924_vm0, %v1922_v3 }
 0x510   :  { %v2969_v62 = vpop.eup %2968 }
 0x511   :  { %v1921_v14 = vmul.f32 0.5, %v2969_v62 }
 0x513   :  { %v1923_v59 = vadd.f32 0.5, %v1921_v14 }
 0x515   :  { %1926 = vst.msk [vmem:[#allocation4 + $0x8] sm:$0xff] %vm1924_vm0, %v1923_v59 }
 0x51c   :  { %v1927_v5 = vld [vmem:[#allocation4] ss:$8 sm:$0x3] }
 0x51d   :  { %v1928_v15 = vpack.c.bf16 %v1927_v5, %v1927_v5 }
 0x51f   :  { %2616 = vmatmul.msk.bf16.vlgmr.msrb.gmra.mxu0 %vm1924_vm0, %v1928_v15 }
 0x59c   :  { %v2008_v27 = vpop.f32.mrf.mxu0 }
 0x59d   :  { %v2009_v28 = vadd.f32 %v2916_v26, %v2008_v27 }
 0x59f   :  { %v2012_v4 = vmul.f32 0.5, %v2009_v28 }
 0x5a1   :  { %2970 = vtanh.f32 %v2012_v4 }
 0x5a4   :  { %v2010_v22 = vpop.f32.mrf.mxu0 }
 0x5a7   :  { %v2971_v29 = vpop.eup %2970 }
 0x5a8   :  { %v2014_v30 = vmul.f32 0.5, %v2971_v29 }
 0x5aa   :  { %v2015_v31 = vadd.f32 0.5, %v2014_v30 }
 0x5ac   :  { %v2016_v34 = vpack.c.bf16 %v2015_v31, %v2015_v31 }
 0x5ae   :  { %2637 = vmatmul.msk.bf16.vlgmr.msrb.gmra.mxu2 %vm780_vm9, %v2016_v34 }
 0x631   :  { %v2080_v36 = vpop.f32.mrf.mxu2 }
 0x632   :  { %v2081_v37 = vadd.f32 %v2917_v35, %v2080_v36 }
 0x634   :  { %2084 = vst [vmem:[#allocation5] sm:$0x3] %v2081_v37 }
 0x635   :  { %2095 = dma.vmem_to_hbm [thread:$0]  %s2091_s28, 32, %s2093_s10, [#allocation6]  }
 0x639   :  { %v2082_v32 = vpop.f32.mrf.mxu2 }
 0x63a   :  { %2996 = dma.done.wait [#allocation6], 32  }
 0x63b   :  { %2997 = vsyncadd [#allocation6], 4294967264 }
 0x63c   :  { %2100 = vsyncpa [#allocation6], 1 }

</bundles_post_ra>
